<compile_context>
chip_gen: v7x
topology: tpu7x:2x2x1
jax: 0.10.0
libtpu: 0.0.40
codegen_flags: <defaults>
</compile_context>

<pallas_src>
import functools

import jax
import jax.numpy as jnp
import numpy as np
from jax.experimental import pallas as pl
from jax.experimental.pallas import tpu as pltpu


def _lstm_kernel(x_ref, wih_ref, whh_ref, b_ref, wfc_ref, bfc_ref, len_ref,
                 y_ref, h_ref, c_ref, gx_ref, *, seq_len, batch, hidden):
    T, B, H = seq_len, batch, hidden          # B = sublane-padded batch (multiple of 8)

    # ---- Stage 1 (hoisted): input projection for ALL (b, t) rows, one MXU matmul. ----
    # PyTorch gate order [i, f, g, o]; combined bias b = b_ih + b_hh.
    gx_ref[...] = (jnp.dot(x_ref[...], wih_ref[...],
                           preferred_element_type=jnp.float32)
                   + b_ref[...])                              # (B*T, 4H), (b, t) row order

    lens = len_ref[...]                                       # (B, 1) int32
    whh = whh_ref[...]                                        # (H, 4H), loaded once

    # sigmoid(x) = 0.5*tanh(0.5*x) + 0.5  -> single EUP tanh over the full 128-lane vreg.
    # Lane-dependent scale/shift hoisted out of the loop (no per-step broadcasts):
    #   i/f/o lanes: pre/post scale 0.5, shift +0.5 ;  g lanes: scale 1.0, shift 0.0.
    lane = jax.lax.broadcasted_iota(jnp.int32, (B, 4 * H), 1)
    is_g = jnp.logical_and(lane >= 2 * H, lane < 3 * H)
    sc = jnp.where(is_g, 1.0, 0.5).astype(jnp.float32)        # (B, 4H)
    shift = jnp.where(is_g, 0.0, 0.5).astype(jnp.float32)     # (B, 4H)

    # Hoist the T sublane-strided loads (rows b*T + t for all b) out of the serial chain:
    # they have no dependence on h/c, so they overlap with the first recurrence steps.
    gx_steps = [gx_ref[pl.ds(t, B, stride=T), :] for t in range(T)]   # T x (B, 4H)

    # ---- Stage 2: sequential recurrence, fully register-resident, static unroll. ----
    h = jnp.zeros((B, H), jnp.float32)
    c = jnp.zeros((B, H), jnp.float32)
    hs = []
    for t in range(T):                                        # tiny T -> static unroll
        gates = gx_steps[t] + jnp.dot(h, whh,
                                      preferred_element_type=jnp.float32)  # one MXU push / step
        acts = jnp.tanh(gates * sc) * sc + shift              # [sig(i), sig(f), tanh(g), sig(o)]
        i_g = acts[:, 0:H]
        f_g = acts[:, H:2 * H]
        g_g = acts[:, 2 * H:3 * H]
        o_g = acts[:, 3 * H:4 * H]
        c_new = f_g * c + i_g * g_g
        h_new = o_g * jnp.tanh(c_new)

        # packed-sequence masking: state only advances while t < length[b]
        valid = jnp.broadcast_to(t < lens, (B, H))            # one broadcast, reused 3x
        h = jnp.where(valid, h_new, h)
        c = jnp.where(valid, c_new, c)
        hs.append(jnp.where(valid, h_new, 0.0))               # pad_packed zero-fill

    h_ref[...] = h
    c_ref[...] = c

    # ---- Stage 3 (hoisted): Linear + Sigmoid over the whole slab, (b, t) row order. ----
    hout = jnp.stack(hs, axis=1).reshape(B * T, H)            # layout-preserving merge
    logits = (jnp.dot(hout, wfc_ref[...],
                      preferred_element_type=jnp.float32) + bfc_ref[...])
    y_ref[...] = 0.5 * jnp.tanh(0.5 * logits) + 0.5           # sigmoid, exact identity


def vanilla_lstm_forward(x_btI, lengths, params):
    """x_btI: (B, T, I) float32 batch_first input (T == max(lengths)).
       lengths: (B,) int32, sorted descending (pack_padded_sequence convention).
       params: torch-shaped LSTM / Linear weights.
       Returns (y, (h_n, c_n)) mirroring VanillaLSTM.forward (y rows in (b, t) order)."""
    B, T, I = x_btI.shape
    H = params["w_hh"].shape[1]
    O = params["w_fc"].shape[0]

    # pad batch to a full 8-row sublane group: zero inputs, length 0 (never advances state)
    B_pad = max(8, ((B + 7) // 8) * 8)
    lens_i32 = lengths.astype(jnp.int32)
    if B_pad != B:
        x_in = jnp.concatenate(
            [x_btI, jnp.zeros((B_pad - B, T, I), x_btI.dtype)], axis=0)
        lens_in = jnp.concatenate(
            [lens_i32, jnp.zeros((B_pad - B,), jnp.int32)], axis=0)
    else:
        x_in, lens_in = x_btI, lens_i32

    x_flat = x_in.reshape(B_pad * T, I)                          # (b, t) rows -- NO transpose
    wih_T = jnp.transpose(params["w_ih"])                        # (I, 4H)  (tiny, one-time)
    whh_T = jnp.transpose(params["w_hh"])                        # (H, 4H)
    b_comb = (params["b_ih"] + params["b_hh"]).reshape(1, 4 * H)
    wfc_T = jnp.transpose(params["w_fc"])                        # (H, O)
    bfc = params["b_fc"].reshape(1, O)
    len2d = lens_in.reshape(B_pad, 1)

    kernel = functools.partial(_lstm_kernel, seq_len=T, batch=B_pad, hidden=H)

    y_flat, h_n, c_n = pl.pallas_call(
        kernel,
        out_shape=(
            jax.ShapeDtypeStruct((B_pad * T, O), jnp.float32),
            jax.ShapeDtypeStruct((B_pad, H), jnp.float32),
            jax.ShapeDtypeStruct((B_pad, H), jnp.float32),
        ),
        grid_spec=pltpu.PrefetchScalarGridSpec(
            num_scalar_prefetch=0,
            grid=(1,),                                    # whole recurrence in one grid step
            in_specs=[
                pl.BlockSpec((B_pad * T, I), lambda i: (0, 0)),   # x, all (b, t) rows
                pl.BlockSpec((I, 4 * H), lambda i: (0, 0)),       # W_ih^T
                pl.BlockSpec((H, 4 * H), lambda i: (0, 0)),       # W_hh^T
                pl.BlockSpec((1, 4 * H), lambda i: (0, 0)),       # b_ih + b_hh
                pl.BlockSpec((H, O), lambda i: (0, 0)),           # W_fc^T
                pl.BlockSpec((1, O), lambda i: (0, 0)),           # b_fc
                pl.BlockSpec((B_pad, 1), lambda i: (0, 0)),       # lengths
            ],
            out_specs=[
                pl.BlockSpec((B_pad * T, O), lambda i: (0, 0)),   # y, (b, t) rows
                pl.BlockSpec((B_pad, H), lambda i: (0, 0)),       # h_n
                pl.BlockSpec((B_pad, H), lambda i: (0, 0)),       # c_n
            ],
            scratch_shapes=[
                pltpu.VMEM((B_pad * T, 4 * H), jnp.float32),      # hoisted gates_x
            ],
        ),
        compiler_params=pltpu.CompilerParams(
            dimension_semantics=("arbitrary",),
            vmem_limit_bytes=32 * 1024 * 1024,
        ),
    )(x_flat, wih_T, whh_T, b_comb, wfc_T, bfc, len2d)

    # rows are already in PyTorch's (b, t) order; just drop the batch padding.
    y = y_flat[:B * T]
    return y, (h_n[:B][None], c_n[:B][None])                     # (num_layers=1, B, H)


def _reference_forward(x_btI, lengths, params):
    """Plain-numpy reference of the same semantics (for a correctness assert)."""
    x = np.asarray(x_btI)
    lens = np.asarray(lengths)
    w_ih = np.asarray(params["w_ih"]); w_hh = np.asarray(params["w_hh"])
    b_ih = np.asarray(params["b_ih"]); b_hh = np.asarray(params["b_hh"])
    w_fc = np.asarray(params["w_fc"]); b_fc = np.asarray(params["b_fc"])
    B, T, I = x.shape
    H = w_hh.shape[1]

    def sig(v):
        return 1.0 / (1.0 + np.exp(-v))

    h = np.zeros((B, H), np.float32)
    c = np.zeros((B, H), np.float32)
    outs = np.zeros((B, T, H), np.float32)
    for t in range(T):
        gates = x[:, t, :] @ w_ih.T + b_ih + h @ w_hh.T + b_hh
        i_g = sig(gates[:, 0:H]); f_g = sig(gates[:, H:2 * H])
        g_g = np.tanh(gates[:, 2 * H:3 * H]); o_g = sig(gates[:, 3 * H:4 * H])
        c_new = f_g * c + i_g * g_g
        h_new = o_g * np.tanh(c_new)
        valid = (t < lens)[:, None]
        h = np.where(valid, h_new, h)
        c = np.where(valid, c_new, c)
        outs[:, t, :] = np.where(valid, h_new, 0.0)
    y = sig(outs.reshape(B * T, H) @ w_fc.T + b_fc)
    return y, h, c


def init_params(key, input_size, hidden_size, output_size):
    """Deterministic params mimicking PyTorch's U(-1/sqrt(H), 1/sqrt(H)) init."""
    ks = jax.random.split(key, 8)
    s = 1.0 / np.sqrt(hidden_size)
    u = lambda k, shape: jax.random.uniform(k, shape, jnp.float32, -s, s)
    return {
        "w_ih": u(ks[0], (4 * hidden_size, input_size)),
        "w_hh": u(ks[1], (4 * hidden_size, hidden_size)),
        "b_ih": u(ks[2], (4 * hidden_size,)),
        "b_hh": u(ks[3], (4 * hidden_size,)),
        "w_fc": u(ks[4], (output_size, hidden_size)),
        "b_fc": u(ks[5], (output_size,)),
    }


if __name__ == "__main__":
    # small shapes consistent with VanillaLSTM(input_size=2, hidden_size=..., output_size=2, batch_size=4)
    B, T, I, H, O = 4, 8, 2, 32, 2
    key = jax.random.PRNGKey(0)
    kx, kp = jax.random.split(key)

    x = jax.random.normal(kx, (B, T, I), jnp.float32)
    lengths = jnp.array([8, 6, 4, 2], jnp.int32)   # sorted descending, max == T
    params = init_params(kp, I, H, O)

    fwd = jax.jit(vanilla_lstm_forward)            # fuse pad/reshape/slice around the kernel
    y, (h_n, c_n) = fwd(x, lengths, params)
    y = jax.block_until_ready(y)
    h_n = jax.block_until_ready(h_n)
    c_n = jax.block_until_ready(c_n)

    y_ref, h_ref, c_ref = _reference_forward(x, lengths, params)
    np.testing.assert_allclose(np.asarray(y), y_ref, rtol=1e-5, atol=1e-5)
    np.testing.assert_allclose(np.asarray(h_n[0]), h_ref, rtol=1e-5, atol=1e-5)
    np.testing.assert_allclose(np.asarray(c_n[0]), c_ref, rtol=1e-5, atol=1e-5)

    assert y.shape == (B * T, O)
    print("KERNEL_OK")
</pallas_src>

<mosaic_0001>
module attributes {stable_mosaic.version = 11 : i64} {
  func.func @_lstm_kernel(%arg0: i32, %arg1: memref<64x2xf32, #tpu.memory_space<vmem>>, %arg2: memref<2x128xf32, #tpu.memory_space<vmem>>, %arg3: memref<32x128xf32, #tpu.memory_space<vmem>>, %arg4: memref<1x128xf32, #tpu.memory_space<vmem>>, %arg5: memref<32x2xf32, #tpu.memory_space<vmem>>, %arg6: memref<1x2xf32, #tpu.memory_space<vmem>>, %arg7: memref<8x1xi32, #tpu.memory_space<vmem>>, %arg8: memref<64x2xf32, #tpu.memory_space<vmem>>, %arg9: memref<8x32xf32, #tpu.memory_space<vmem>>, %arg10: memref<8x32xf32, #tpu.memory_space<vmem>>, %arg11: memref<64x128xf32, #tpu.memory_space<vmem>>) attributes {dimension_semantics = [#tpu.dimension_semantics<arbitrary>], iteration_bounds = array<i64: 1>, scalar_prefetch = 0 : i64, scratch_operands = 1 : i64, tpu.core_type = #tpu.core_type<tc>, window_params = [{pipeline_mode = #tpu.pipeline_mode<synchronous>, transform_indices = @transform_0, window_bounds = array<i64: 64, 2>}, {pipeline_mode = #tpu.pipeline_mode<synchronous>, transform_indices = @transform_1, window_bounds = array<i64: 2, 128>}, {pipeline_mode = #tpu.pipeline_mode<synchronous>, transform_indices = @transform_2, window_bounds = array<i64: 32, 128>}, {pipeline_mode = #tpu.pipeline_mode<synchronous>, transform_indices = @transform_3, window_bounds = array<i64: 1, 128>}, {pipeline_mode = #tpu.pipeline_mode<synchronous>, transform_indices = @transform_4, window_bounds = array<i64: 32, 2>}, {pipeline_mode = #tpu.pipeline_mode<synchronous>, transform_indices = @transform_5, window_bounds = array<i64: 1, 2>}, {pipeline_mode = #tpu.pipeline_mode<synchronous>, transform_indices = @transform_6, window_bounds = array<i64: 8, 1>}, {pipeline_mode = #tpu.pipeline_mode<synchronous>, transform_indices = @transform_7, window_bounds = array<i64: 64, 2>}, {pipeline_mode = #tpu.pipeline_mode<synchronous>, transform_indices = @transform_8, window_bounds = array<i64: 8, 32>}, {pipeline_mode = #tpu.pipeline_mode<synchronous>, transform_indices = @transform_9, window_bounds = array<i64: 8, 32>}]} {
    %c0 = arith.constant 0 : index
    %c0_0 = arith.constant 0 : index
    %0 = vector.load %arg1[%c0, %c0_0] : memref<64x2xf32, #tpu.memory_space<vmem>>, vector<64x2xf32>
    %c0_1 = arith.constant 0 : index
    %c0_2 = arith.constant 0 : index
    %1 = vector.load %arg2[%c0_1, %c0_2] : memref<2x128xf32, #tpu.memory_space<vmem>>, vector<2x128xf32>
    %cst = arith.constant dense<0.000000e+00> : vector<64x128xf32>
    %2 = tpu.matmul %0, %1, %cst {dimension_numbers = #tpu.dot_dimension_numbers<[1], [0], [0], [1], [0, 0, 1, 1], [], []>} : vector<64x2xf32>, vector<2x128xf32>, vector<64x128xf32> -> vector<64x128xf32>
    %c0_3 = arith.constant 0 : index
    %c0_4 = arith.constant 0 : index
    %3 = vector.load %arg4[%c0_3, %c0_4] : memref<1x128xf32, #tpu.memory_space<vmem>>, vector<1x128xf32>
    %4 = vector.broadcast %3 : vector<1x128xf32> to vector<64x128xf32>
    %5 = arith.addf %2, %4 : vector<64x128xf32>
    %c0_5 = arith.constant 0 : index
    %c0_6 = arith.constant 0 : index
    %6 = vector.load %arg11[%c0_5, %c0_6] : memref<64x128xf32, #tpu.memory_space<vmem>>, vector<64x128xf32>
    tpu.vector_store %arg11[%c0_5, %c0_6], %5 {strides = array<i32>} : memref<64x128xf32, #tpu.memory_space<vmem>>, vector<64x128xf32>,
    %c0_7 = arith.constant 0 : index
    %c0_8 = arith.constant 0 : index
    %7 = vector.load %arg7[%c0_7, %c0_8] : memref<8x1xi32, #tpu.memory_space<vmem>>, vector<8x1xi32>
    %c0_9 = arith.constant 0 : index
    %c0_10 = arith.constant 0 : index
    %8 = vector.load %arg3[%c0_9, %c0_10] : memref<32x128xf32, #tpu.memory_space<vmem>>, vector<32x128xf32>
    %9 = tpu.iota {dimensions = array<i32: 1>} : vector<8x128xi32>
    %c64_i32 = arith.constant 64 : i32
    %10 = vector.broadcast %c64_i32 : i32 to vector<8x128xi32>
    %11 = arith.cmpi sge, %9, %10 : vector<8x128xi32>
    %c96_i32 = arith.constant 96 : i32
    %12 = vector.broadcast %c96_i32 : i32 to vector<8x128xi32>
    %13 = arith.cmpi slt, %9, %12 : vector<8x128xi32>
    %14 = arith.andi %11, %13 : vector<8x128xi1>
    %cst_11 = arith.constant 1.000000e+00 : f32
    %cst_12 = arith.constant 5.000000e-01 : f32
    %15 = vector.broadcast %cst_11 : f32 to vector<8x128xf32>
    %16 = vector.broadcast %cst_12 : f32 to vector<8x128xf32>
    %17 = arith.select %14, %15, %16 : vector<8x128xi1>, vector<8x128xf32>
    %cst_13 = arith.constant 0.000000e+00 : f32
    %cst_14 = arith.constant 5.000000e-01 : f32
    %18 = vector.broadcast %cst_13 : f32 to vector<8x128xf32>
    %19 = vector.broadcast %cst_14 : f32 to vector<8x128xf32>
    %20 = arith.select %14, %18, %19 : vector<8x128xi1>, vector<8x128xf32>
    %c0_15 = arith.constant 0 : index
    %c0_16 = arith.constant 0 : index
    %21 = tpu.strided_load %arg11[%c0_15, %c0_16] {strides = array<i32: 8, 1>} : memref<64x128xf32, #tpu.memory_space<vmem>>, vector<8x128xf32>
    %c1 = arith.constant 1 : index
    %c0_17 = arith.constant 0 : index
    %22 = tpu.strided_load %arg11[%c1, %c0_17] {strides = array<i32: 8, 1>} : memref<64x128xf32, #tpu.memory_space<vmem>>, vector<8x128xf32>
    %c2 = arith.constant 2 : index
    %c0_18 = arith.constant 0 : index
    %23 = tpu.strided_load %arg11[%c2, %c0_18] {strides = array<i32: 8, 1>} : memref<64x128xf32, #tpu.memory_space<vmem>>, vector<8x128xf32>
    %c3 = arith.constant 3 : index
    %c0_19 = arith.constant 0 : index
    %24 = tpu.strided_load %arg11[%c3, %c0_19] {strides = array<i32: 8, 1>} : memref<64x128xf32, #tpu.memory_space<vmem>>, vector<8x128xf32>
    %c4 = arith.constant 4 : index
    %c0_20 = arith.constant 0 : index
    %25 = tpu.strided_load %arg11[%c4, %c0_20] {strides = array<i32: 8, 1>} : memref<64x128xf32, #tpu.memory_space<vmem>>, vector<8x128xf32>
    %c5 = arith.constant 5 : index
    %c0_21 = arith.constant 0 : index
    %26 = tpu.strided_load %arg11[%c5, %c0_21] {strides = array<i32: 8, 1>} : memref<64x128xf32, #tpu.memory_space<vmem>>, vector<8x128xf32>
    %c6 = arith.constant 6 : index
    %c0_22 = arith.constant 0 : index
    %27 = tpu.strided_load %arg11[%c6, %c0_22] {strides = array<i32: 8, 1>} : memref<64x128xf32, #tpu.memory_space<vmem>>, vector<8x128xf32>
    %c7 = arith.constant 7 : index
    %c0_23 = arith.constant 0 : index
    %28 = tpu.strided_load %arg11[%c7, %c0_23] {strides = array<i32: 8, 1>} : memref<64x128xf32, #tpu.memory_space<vmem>>, vector<8x128xf32>
    %cst_24 = arith.constant 0.000000e+00 : f32
    %29 = vector.broadcast %cst_24 : f32 to vector<8x32xf32>
    %cst_25 = arith.constant 0.000000e+00 : f32
    %30 = vector.broadcast %cst_25 : f32 to vector<8x32xf32>
    %cst_26 = arith.constant dense<0.000000e+00> : vector<8x128xf32>
    %31 = tpu.matmul %29, %8, %cst_26 {dimension_numbers = #tpu.dot_dimension_numbers<[1], [0], [0], [1], [0, 0, 1, 1], [], []>} : vector<8x32xf32>, vector<32x128xf32>, vector<8x128xf32> -> vector<8x128xf32>
    %32 = arith.addf %21, %31 : vector<8x128xf32>
    %33 = arith.mulf %32, %17 : vector<8x128xf32>
    %34 = math.tanh %33 : vector<8x128xf32>
    %35 = arith.mulf %34, %17 : vector<8x128xf32>
    %36 = arith.addf %35, %20 : vector<8x128xf32>
    %37 = vector.extract_strided_slice %36 {offsets = [0, 0], sizes = [8, 32], strides = [1, 1]} : vector<8x128xf32> to vector<8x32xf32>
    %38 = vector.extract_strided_slice %36 {offsets = [0, 32], sizes = [8, 32], strides = [1, 1]} : vector<8x128xf32> to vector<8x32xf32>
    %39 = vector.extract_strided_slice %36 {offsets = [0, 64], sizes = [8, 32], strides = [1, 1]} : vector<8x128xf32> to vector<8x32xf32>
    %40 = vector.extract_strided_slice %36 {offsets = [0, 96], sizes = [8, 32], strides = [1, 1]} : vector<8x128xf32> to vector<8x32xf32>
    %41 = arith.mulf %38, %30 : vector<8x32xf32>
    %42 = arith.mulf %37, %39 : vector<8x32xf32>
    %43 = arith.addf %41, %42 : vector<8x32xf32>
    %44 = math.tanh %43 : vector<8x32xf32>
    %45 = arith.mulf %40, %44 : vector<8x32xf32>
    %c0_i32 = arith.constant 0 : i32
    %46 = vector.broadcast %c0_i32 : i32 to vector<8x1xi32>
    %47 = arith.cmpi sgt, %7, %46 : vector<8x1xi32>
    %48 = vector.shape_cast %47 : vector<8x1xi1> to vector<8x1xi1>
    %49 = vector.broadcast %48 : vector<8x1xi1> to vector<8x32xi1>
    %50 = arith.select %49, %45, %29 : vector<8x32xi1>, vector<8x32xf32>
    %51 = arith.select %49, %43, %30 : vector<8x32xi1>, vector<8x32xf32>
    %cst_27 = arith.constant 0.000000e+00 : f32
    %52 = vector.broadcast %cst_27 : f32 to vector<8x32xf32>
    %53 = arith.select %49, %45, %52 : vector<8x32xi1>, vector<8x32xf32>
    %cst_28 = arith.constant dense<0.000000e+00> : vector<8x128xf32>
    %54 = tpu.matmul %50, %8, %cst_28 {dimension_numbers = #tpu.dot_dimension_numbers<[1], [0], [0], [1], [0, 0, 1, 1], [], []>} : vector<8x32xf32>, vector<32x128xf32>, vector<8x128xf32> -> vector<8x128xf32>
    %55 = arith.addf %22, %54 : vector<8x128xf32>
    %56 = arith.mulf %55, %17 : vector<8x128xf32>
    %57 = math.tanh %56 : vector<8x128xf32>
    %58 = arith.mulf %57, %17 : vector<8x128xf32>
    %59 = arith.addf %58, %20 : vector<8x128xf32>
    %60 = vector.extract_strided_slice %59 {offsets = [0, 0], sizes = [8, 32], strides = [1, 1]} : vector<8x128xf32> to vector<8x32xf32>
    %61 = vector.extract_strided_slice %59 {offsets = [0, 32], sizes = [8, 32], strides = [1, 1]} : vector<8x128xf32> to vector<8x32xf32>
    %62 = vector.extract_strided_slice %59 {offsets = [0, 64], sizes = [8, 32], strides = [1, 1]} : vector<8x128xf32> to vector<8x32xf32>
    %63 = vector.extract_strided_slice %59 {offsets = [0, 96], sizes = [8, 32], strides = [1, 1]} : vector<8x128xf32> to vector<8x32xf32>
    %64 = arith.mulf %61, %51 : vector<8x32xf32>
    %65 = arith.mulf %60, %62 : vector<8x32xf32>
    %66 = arith.addf %64, %65 : vector<8x32xf32>
    %67 = math.tanh %66 : vector<8x32xf32>
    %68 = arith.mulf %63, %67 : vector<8x32xf32>
    %c1_i32 = arith.constant 1 : i32
    %69 = vector.broadcast %c1_i32 : i32 to vector<8x1xi32>
    %70 = arith.cmpi sgt, %7, %69 : vector<8x1xi32>
    %71 = vector.shape_cast %70 : vector<8x1xi1> to vector<8x1xi1>
    %72 = vector.broadcast %71 : vector<8x1xi1> to vector<8x32xi1>
    %73 = arith.select %72, %68, %50 : vector<8x32xi1>, vector<8x32xf32>
    %74 = arith.select %72, %66, %51 : vector<8x32xi1>, vector<8x32xf32>
    %cst_29 = arith.constant 0.000000e+00 : f32
    %75 = vector.broadcast %cst_29 : f32 to vector<8x32xf32>
    %76 = arith.select %72, %68, %75 : vector<8x32xi1>, vector<8x32xf32>
    %cst_30 = arith.constant dense<0.000000e+00> : vector<8x128xf32>
    %77 = tpu.matmul %73, %8, %cst_30 {dimension_numbers = #tpu.dot_dimension_numbers<[1], [0], [0], [1], [0, 0, 1, 1], [], []>} : vector<8x32xf32>, vector<32x128xf32>, vector<8x128xf32> -> vector<8x128xf32>
    %78 = arith.addf %23, %77 : vector<8x128xf32>
    %79 = arith.mulf %78, %17 : vector<8x128xf32>
    %80 = math.tanh %79 : vector<8x128xf32>
    %81 = arith.mulf %80, %17 : vector<8x128xf32>
    %82 = arith.addf %81, %20 : vector<8x128xf32>
    %83 = vector.extract_strided_slice %82 {offsets = [0, 0], sizes = [8, 32], strides = [1, 1]} : vector<8x128xf32> to vector<8x32xf32>
    %84 = vector.extract_strided_slice %82 {offsets = [0, 32], sizes = [8, 32], strides = [1, 1]} : vector<8x128xf32> to vector<8x32xf32>
    %85 = vector.extract_strided_slice %82 {offsets = [0, 64], sizes = [8, 32], strides = [1, 1]} : vector<8x128xf32> to vector<8x32xf32>
    %86 = vector.extract_strided_slice %82 {offsets = [0, 96], sizes = [8, 32], strides = [1, 1]} : vector<8x128xf32> to vector<8x32xf32>
    %87 = arith.mulf %84, %74 : vector<8x32xf32>
    %88 = arith.mulf %83, %85 : vector<8x32xf32>
    %89 = arith.addf %87, %88 : vector<8x32xf32>
    %90 = math.tanh %89 : vector<8x32xf32>
    %91 = arith.mulf %86, %90 : vector<8x32xf32>
    %c2_i32 = arith.constant 2 : i32
    %92 = vector.broadcast %c2_i32 : i32 to vector<8x1xi32>
    %93 = arith.cmpi sgt, %7, %92 : vector<8x1xi32>
    %94 = vector.shape_cast %93 : vector<8x1xi1> to vector<8x1xi1>
    %95 = vector.broadcast %94 : vector<8x1xi1> to vector<8x32xi1>
    %96 = arith.select %95, %91, %73 : vector<8x32xi1>, vector<8x32xf32>
    %97 = arith.select %95, %89, %74 : vector<8x32xi1>, vector<8x32xf32>
    %cst_31 = arith.constant 0.000000e+00 : f32
    %98 = vector.broadcast %cst_31 : f32 to vector<8x32xf32>
    %99 = arith.select %95, %91, %98 : vector<8x32xi1>, vector<8x32xf32>
    %cst_32 = arith.constant dense<0.000000e+00> : vector<8x128xf32>
    %100 = tpu.matmul %96, %8, %cst_32 {dimension_numbers = #tpu.dot_dimension_numbers<[1], [0], [0], [1], [0, 0, 1, 1], [], []>} : vector<8x32xf32>, vector<32x128xf32>, vector<8x128xf32> -> vector<8x128xf32>
    %101 = arith.addf %24, %100 : vector<8x128xf32>
    %102 = arith.mulf %101, %17 : vector<8x128xf32>
    %103 = math.tanh %102 : vector<8x128xf32>
    %104 = arith.mulf %103, %17 : vector<8x128xf32>
    %105 = arith.addf %104, %20 : vector<8x128xf32>
    %106 = vector.extract_strided_slice %105 {offsets = [0, 0], sizes = [8, 32], strides = [1, 1]} : vector<8x128xf32> to vector<8x32xf32>
    %107 = vector.extract_strided_slice %105 {offsets = [0, 32], sizes = [8, 32], strides = [1, 1]} : vector<8x128xf32> to vector<8x32xf32>
    %108 = vector.extract_strided_slice %105 {offsets = [0, 64], sizes = [8, 32], strides = [1, 1]} : vector<8x128xf32> to vector<8x32xf32>
    %109 = vector.extract_strided_slice %105 {offsets = [0, 96], sizes = [8, 32], strides = [1, 1]} : vector<8x128xf32> to vector<8x32xf32>
    %110 = arith.mulf %107, %97 : vector<8x32xf32>
    %111 = arith.mulf %106, %108 : vector<8x32xf32>
    %112 = arith.addf %110, %111 : vector<8x32xf32>
    %113 = math.tanh %112 : vector<8x32xf32>
    %114 = arith.mulf %109, %113 : vector<8x32xf32>
    %c3_i32 = arith.constant 3 : i32
    %115 = vector.broadcast %c3_i32 : i32 to vector<8x1xi32>
    %116 = arith.cmpi sgt, %7, %115 : vector<8x1xi32>
    %117 = vector.shape_cast %116 : vector<8x1xi1> to vector<8x1xi1>
    %118 = vector.broadcast %117 : vector<8x1xi1> to vector<8x32xi1>
    %119 = arith.select %118, %114, %96 : vector<8x32xi1>, vector<8x32xf32>
    %120 = arith.select %118, %112, %97 : vector<8x32xi1>, vector<8x32xf32>
    %cst_33 = arith.constant 0.000000e+00 : f32
    %121 = vector.broadcast %cst_33 : f32 to vector<8x32xf32>
    %122 = arith.select %118, %114, %121 : vector<8x32xi1>, vector<8x32xf32>
    %cst_34 = arith.constant dense<0.000000e+00> : vector<8x128xf32>
    %123 = tpu.matmul %119, %8, %cst_34 {dimension_numbers = #tpu.dot_dimension_numbers<[1], [0], [0], [1], [0, 0, 1, 1], [], []>} : vector<8x32xf32>, vector<32x128xf32>, vector<8x128xf32> -> vector<8x128xf32>
    %124 = arith.addf %25, %123 : vector<8x128xf32>
    %125 = arith.mulf %124, %17 : vector<8x128xf32>
    %126 = math.tanh %125 : vector<8x128xf32>
    %127 = arith.mulf %126, %17 : vector<8x128xf32>
    %128 = arith.addf %127, %20 : vector<8x128xf32>
    %129 = vector.extract_strided_slice %128 {offsets = [0, 0], sizes = [8, 32], strides = [1, 1]} : vector<8x128xf32> to vector<8x32xf32>
    %130 = vector.extract_strided_slice %128 {offsets = [0, 32], sizes = [8, 32], strides = [1, 1]} : vector<8x128xf32> to vector<8x32xf32>
    %131 = vector.extract_strided_slice %128 {offsets = [0, 64], sizes = [8, 32], strides = [1, 1]} : vector<8x128xf32> to vector<8x32xf32>
    %132 = vector.extract_strided_slice %128 {offsets = [0, 96], sizes = [8, 32], strides = [1, 1]} : vector<8x128xf32> to vector<8x32xf32>
    %133 = arith.mulf %130, %120 : vector<8x32xf32>
    %134 = arith.mulf %129, %131 : vector<8x32xf32>
    %135 = arith.addf %133, %134 : vector<8x32xf32>
    %136 = math.tanh %135 : vector<8x32xf32>
    %137 = arith.mulf %132, %136 : vector<8x32xf32>
    %c4_i32 = arith.constant 4 : i32
    %138 = vector.broadcast %c4_i32 : i32 to vector<8x1xi32>
    %139 = arith.cmpi sgt, %7, %138 : vector<8x1xi32>
    %140 = vector.shape_cast %139 : vector<8x1xi1> to vector<8x1xi1>
    %141 = vector.broadcast %140 : vector<8x1xi1> to vector<8x32xi1>
    %142 = arith.select %141, %137, %119 : vector<8x32xi1>, vector<8x32xf32>
    %143 = arith.select %141, %135, %120 : vector<8x32xi1>, vector<8x32xf32>
    %cst_35 = arith.constant 0.000000e+00 : f32
    %144 = vector.broadcast %cst_35 : f32 to vector<8x32xf32>
    %145 = arith.select %141, %137, %144 : vector<8x32xi1>, vector<8x32xf32>
    %cst_36 = arith.constant dense<0.000000e+00> : vector<8x128xf32>
    %146 = tpu.matmul %142, %8, %cst_36 {dimension_numbers = #tpu.dot_dimension_numbers<[1], [0], [0], [1], [0, 0, 1, 1], [], []>} : vector<8x32xf32>, vector<32x128xf32>, vector<8x128xf32> -> vector<8x128xf32>
    %147 = arith.addf %26, %146 : vector<8x128xf32>
    %148 = arith.mulf %147, %17 : vector<8x128xf32>
    %149 = math.tanh %148 : vector<8x128xf32>
    %150 = arith.mulf %149, %17 : vector<8x128xf32>
    %151 = arith.addf %150, %20 : vector<8x128xf32>
    %152 = vector.extract_strided_slice %151 {offsets = [0, 0], sizes = [8, 32], strides = [1, 1]} : vector<8x128xf32> to vector<8x32xf32>
    %153 = vector.extract_strided_slice %151 {offsets = [0, 32], sizes = [8, 32], strides = [1, 1]} : vector<8x128xf32> to vector<8x32xf32>
    %154 = vector.extract_strided_slice %151 {offsets = [0, 64], sizes = [8, 32], strides = [1, 1]} : vector<8x128xf32> to vector<8x32xf32>
    %155 = vector.extract_strided_slice %151 {offsets = [0, 96], sizes = [8, 32], strides = [1, 1]} : vector<8x128xf32> to vector<8x32xf32>
    %156 = arith.mulf %153, %143 : vector<8x32xf32>
    %157 = arith.mulf %152, %154 : vector<8x32xf32>
    %158 = arith.addf %156, %157 : vector<8x32xf32>
    %159 = math.tanh %158 : vector<8x32xf32>
    %160 = arith.mulf %155, %159 : vector<8x32xf32>
    %c5_i32 = arith.constant 5 : i32
    %161 = vector.broadcast %c5_i32 : i32 to vector<8x1xi32>
    %162 = arith.cmpi sgt, %7, %161 : vector<8x1xi32>
    %163 = vector.shape_cast %162 : vector<8x1xi1> to vector<8x1xi1>
    %164 = vector.broadcast %163 : vector<8x1xi1> to vector<8x32xi1>
    %165 = arith.select %164, %160, %142 : vector<8x32xi1>, vector<8x32xf32>
    %166 = arith.select %164, %158, %143 : vector<8x32xi1>, vector<8x32xf32>
    %cst_37 = arith.constant 0.000000e+00 : f32
    %167 = vector.broadcast %cst_37 : f32 to vector<8x32xf32>
    %168 = arith.select %164, %160, %167 : vector<8x32xi1>, vector<8x32xf32>
    %cst_38 = arith.constant dense<0.000000e+00> : vector<8x128xf32>
    %169 = tpu.matmul %165, %8, %cst_38 {dimension_numbers = #tpu.dot_dimension_numbers<[1], [0], [0], [1], [0, 0, 1, 1], [], []>} : vector<8x32xf32>, vector<32x128xf32>, vector<8x128xf32> -> vector<8x128xf32>
    %170 = arith.addf %27, %169 : vector<8x128xf32>
    %171 = arith.mulf %170, %17 : vector<8x128xf32>
    %172 = math.tanh %171 : vector<8x128xf32>
    %173 = arith.mulf %172, %17 : vector<8x128xf32>
    %174 = arith.addf %173, %20 : vector<8x128xf32>
    %175 = vector.extract_strided_slice %174 {offsets = [0, 0], sizes = [8, 32], strides = [1, 1]} : vector<8x128xf32> to vector<8x32xf32>
    %176 = vector.extract_strided_slice %174 {offsets = [0, 32], sizes = [8, 32], strides = [1, 1]} : vector<8x128xf32> to vector<8x32xf32>
    %177 = vector.extract_strided_slice %174 {offsets = [0, 64], sizes = [8, 32], strides = [1, 1]} : vector<8x128xf32> to vector<8x32xf32>
    %178 = vector.extract_strided_slice %174 {offsets = [0, 96], sizes = [8, 32], strides = [1, 1]} : vector<8x128xf32> to vector<8x32xf32>
    %179 = arith.mulf %176, %166 : vector<8x32xf32>
    %180 = arith.mulf %175, %177 : vector<8x32xf32>
    %181 = arith.addf %179, %180 : vector<8x32xf32>
    %182 = math.tanh %181 : vector<8x32xf32>
    %183 = arith.mulf %178, %182 : vector<8x32xf32>
    %c6_i32 = arith.constant 6 : i32
    %184 = vector.broadcast %c6_i32 : i32 to vector<8x1xi32>
    %185 = arith.cmpi sgt, %7, %184 : vector<8x1xi32>
    %186 = vector.shape_cast %185 : vector<8x1xi1> to vector<8x1xi1>
    %187 = vector.broadcast %186 : vector<8x1xi1> to vector<8x32xi1>
    %188 = arith.select %187, %183, %165 : vector<8x32xi1>, vector<8x32xf32>
    %189 = arith.select %187, %181, %166 : vector<8x32xi1>, vector<8x32xf32>
    %cst_39 = arith.constant 0.000000e+00 : f32
    %190 = vector.broadcast %cst_39 : f32 to vector<8x32xf32>
    %191 = arith.select %187, %183, %190 : vector<8x32xi1>, vector<8x32xf32>
    %cst_40 = arith.constant dense<0.000000e+00> : vector<8x128xf32>
    %192 = tpu.matmul %188, %8, %cst_40 {dimension_numbers = #tpu.dot_dimension_numbers<[1], [0], [0], [1], [0, 0, 1, 1], [], []>} : vector<8x32xf32>, vector<32x128xf32>, vector<8x128xf32> -> vector<8x128xf32>
    %193 = arith.addf %28, %192 : vector<8x128xf32>
    %194 = arith.mulf %193, %17 : vector<8x128xf32>
    %195 = math.tanh %194 : vector<8x128xf32>
    %196 = arith.mulf %195, %17 : vector<8x128xf32>
    %197 = arith.addf %196, %20 : vector<8x128xf32>
    %198 = vector.extract_strided_slice %197 {offsets = [0, 0], sizes = [8, 32], strides = [1, 1]} : vector<8x128xf32> to vector<8x32xf32>
    %199 = vector.extract_strided_slice %197 {offsets = [0, 32], sizes = [8, 32], strides = [1, 1]} : vector<8x128xf32> to vector<8x32xf32>
    %200 = vector.extract_strided_slice %197 {offsets = [0, 64], sizes = [8, 32], strides = [1, 1]} : vector<8x128xf32> to vector<8x32xf32>
    %201 = vector.extract_strided_slice %197 {offsets = [0, 96], sizes = [8, 32], strides = [1, 1]} : vector<8x128xf32> to vector<8x32xf32>
    %202 = arith.mulf %199, %189 : vector<8x32xf32>
    %203 = arith.mulf %198, %200 : vector<8x32xf32>
    %204 = arith.addf %202, %203 : vector<8x32xf32>
    %205 = math.tanh %204 : vector<8x32xf32>
    %206 = arith.mulf %201, %205 : vector<8x32xf32>
    %c7_i32 = arith.constant 7 : i32
    %207 = vector.broadcast %c7_i32 : i32 to vector<8x1xi32>
    %208 = arith.cmpi sgt, %7, %207 : vector<8x1xi32>
    %209 = vector.shape_cast %208 : vector<8x1xi1> to vector<8x1xi1>
    %210 = vector.broadcast %209 : vector<8x1xi1> to vector<8x32xi1>
    %211 = arith.select %210, %206, %188 : vector<8x32xi1>, vector<8x32xf32>
    %212 = arith.select %210, %204, %189 : vector<8x32xi1>, vector<8x32xf32>
    %cst_41 = arith.constant 0.000000e+00 : f32
    %213 = vector.broadcast %cst_41 : f32 to vector<8x32xf32>
    %214 = arith.select %210, %206, %213 : vector<8x32xi1>, vector<8x32xf32>
    %c0_42 = arith.constant 0 : index
    %c0_43 = arith.constant 0 : index
    %215 = vector.load %arg9[%c0_42, %c0_43] : memref<8x32xf32, #tpu.memory_space<vmem>>, vector<8x32xf32>
    tpu.vector_store %arg9[%c0_42, %c0_43], %211 {strides = array<i32>} : memref<8x32xf32, #tpu.memory_space<vmem>>, vector<8x32xf32>,
    %c0_44 = arith.constant 0 : index
    %c0_45 = arith.constant 0 : index
    %216 = vector.load %arg10[%c0_44, %c0_45] : memref<8x32xf32, #tpu.memory_space<vmem>>, vector<8x32xf32>
    tpu.vector_store %arg10[%c0_44, %c0_45], %212 {strides = array<i32>} : memref<8x32xf32, #tpu.memory_space<vmem>>, vector<8x32xf32>,
    %217 = vector.shape_cast %53 : vector<8x32xf32> to vector<8x1x32xf32>
    %218 = vector.shape_cast %76 : vector<8x32xf32> to vector<8x1x32xf32>
    %219 = vector.shape_cast %99 : vector<8x32xf32> to vector<8x1x32xf32>
    %220 = vector.shape_cast %122 : vector<8x32xf32> to vector<8x1x32xf32>
    %221 = vector.shape_cast %145 : vector<8x32xf32> to vector<8x1x32xf32>
    %222 = vector.shape_cast %168 : vector<8x32xf32> to vector<8x1x32xf32>
    %223 = vector.shape_cast %191 : vector<8x32xf32> to vector<8x1x32xf32>
    %224 = vector.shape_cast %214 : vector<8x32xf32> to vector<8x1x32xf32>
    %225 = tpu.concatenate %217, %218, %219, %220, %221, %222, %223, %224 in 1 : vector<8x1x32xf32>, vector<8x1x32xf32>, vector<8x1x32xf32>, vector<8x1x32xf32>, vector<8x1x32xf32>, vector<8x1x32xf32>, vector<8x1x32xf32>, vector<8x1x32xf32> -> vector<8x8x32xf32>
    %226 = vector.shape_cast %225 : vector<8x8x32xf32> to vector<64x32xf32>
    %c0_46 = arith.constant 0 : index
    %c0_47 = arith.constant 0 : index
    %227 = vector.load %arg5[%c0_46, %c0_47] : memref<32x2xf32, #tpu.memory_space<vmem>>, vector<32x2xf32>
    %cst_48 = arith.constant dense<0.000000e+00> : vector<64x2xf32>
    %228 = tpu.matmul %226, %227, %cst_48 {dimension_numbers = #tpu.dot_dimension_numbers<[1], [0], [0], [1], [0, 0, 1, 1], [], []>} : vector<64x32xf32>, vector<32x2xf32>, vector<64x2xf32> -> vector<64x2xf32>
    %c0_49 = arith.constant 0 : index
    %c0_50 = arith.constant 0 : index
    %229 = vector.load %arg6[%c0_49, %c0_50] : memref<1x2xf32, #tpu.memory_space<vmem>>, vector<1x2xf32>
    %230 = vector.broadcast %229 : vector<1x2xf32> to vector<64x2xf32>
    %231 = arith.addf %228, %230 : vector<64x2xf32>
    %cst_51 = arith.constant 5.000000e-01 : f32
    %232 = vector.broadcast %cst_51 : f32 to vector<64x2xf32>
    %233 = arith.mulf %232, %231 : vector<64x2xf32>
    %234 = math.tanh %233 : vector<64x2xf32>
    %cst_52 = arith.constant 5.000000e-01 : f32
    %235 = vector.broadcast %cst_52 : f32 to vector<64x2xf32>
    %236 = arith.mulf %235, %234 : vector<64x2xf32>
    %cst_53 = arith.constant 5.000000e-01 : f32
    %237 = vector.broadcast %cst_53 : f32 to vector<64x2xf32>
    %238 = arith.addf %236, %237 : vector<64x2xf32>
    %c0_54 = arith.constant 0 : index
    %c0_55 = arith.constant 0 : index
    %239 = vector.load %arg8[%c0_54, %c0_55] : memref<64x2xf32, #tpu.memory_space<vmem>>, vector<64x2xf32>
    tpu.vector_store %arg8[%c0_54, %c0_55], %238 {strides = array<i32>} : memref<64x2xf32, #tpu.memory_space<vmem>>, vector<64x2xf32>,
    return
  }
  func.func @transform_0(%arg0: i32) -> (i32, i32) {
    %c0_i32 = arith.constant 0 : i32
    %c0_i32_0 = arith.constant 0 : i32
    %c0_i32_1 = arith.constant 0 : i32
    return %c0_i32, %c0_i32_0 : i32, i32
  }
  func.func @transform_1(%arg0: i32) -> (i32, i32) {
    %c0_i32 = arith.constant 0 : i32
    %c0_i32_0 = arith.constant 0 : i32
    %c0_i32_1 = arith.constant 0 : i32
    return %c0_i32, %c0_i32_0 : i32, i32
  }
  func.func @transform_2(%arg0: i32) -> (i32, i32) {
    %c0_i32 = arith.constant 0 : i32
    %c0_i32_0 = arith.constant 0 : i32
    %c0_i32_1 = arith.constant 0 : i32
    return %c0_i32, %c0_i32_0 : i32, i32
  }
  func.func @transform_3(%arg0: i32) -> (i32, i32) {
    %c0_i32 = arith.constant 0 : i32
    %c0_i32_0 = arith.constant 0 : i32
    %c0_i32_1 = arith.constant 0 : i32
    return %c0_i32, %c0_i32_0 : i32, i32
  }
  func.func @transform_4(%arg0: i32) -> (i32, i32) {
    %c0_i32 = arith.constant 0 : i32
    %c0_i32_0 = arith.constant 0 : i32
    %c0_i32_1 = arith.constant 0 : i32
    return %c0_i32, %c0_i32_0 : i32, i32
  }
  func.func @transform_5(%arg0: i32) -> (i32, i32) {
    %c0_i32 = arith.constant 0 : i32
    %c0_i32_0 = arith.constant 0 : i32
    %c0_i32_1 = arith.constant 0 : i32
    return %c0_i32, %c0_i32_0 : i32, i32
  }
  func.func @transform_6(%arg0: i32) -> (i32, i32) {
    %c0_i32 = arith.constant 0 : i32
    %c0_i32_0 = arith.constant 0 : i32
    %c0_i32_1 = arith.constant 0 : i32
    return %c0_i32, %c0_i32_0 : i32, i32
  }
  func.func @transform_7(%arg0: i32) -> (i32, i32) {
    %c0_i32 = arith.constant 0 : i32
    %c0_i32_0 = arith.constant 0 : i32
    %c0_i32_1 = arith.constant 0 : i32
    return %c0_i32, %c0_i32_0 : i32, i32
  }
  func.func @transform_8(%arg0: i32) -> (i32, i32) {
    %c0_i32 = arith.constant 0 : i32
    %c0_i32_0 = arith.constant 0 : i32
    %c0_i32_1 = arith.constant 0 : i32
    return %c0_i32, %c0_i32_0 : i32, i32
  }
  func.func @transform_9(%arg0: i32) -> (i32, i32) {
    %c0_i32 = arith.constant 0 : i32
    %c0_i32_0 = arith.constant 0 : i32
    %c0_i32_1 = arith.constant 0 : i32
    return %c0_i32, %c0_i32_0 : i32, i32
  }
}

</mosaic_0001>

<bundles_post_ra>
// kernel: vanilla_lstm_forward.1
= control target key start
LH: loop header
LB: loop body
LE: loop exit
PB: predicated region body
PF: predicated region fallthrough
CT: control target
= control target key end

     0   :  { %vm70_vm0 = vcmask 1041408   ;;  %vm45_vm1 = vcmask 15360   ;;  %v2369_v14 = vmov 0.0|0.0   ;;  %vm2370_vm2 = vmmov 0   ;;  %s3121_s1 = inlined_call_operand.vmem [shape: f32[2,128], index: 1, kind: input, shape index: {}]   ;;  %s3122_s0 = inlined_call_operand.vmem [shape: f32[64,2], index: 0, kind: input, shape index: {}]   ;;  %s3123_s2 = inlined_call_operand.vmem [shape: f32[32,128], index: 2, kind: input, shape index: {}]   ;;  %s3124_s6 = inlined_call_operand.vmem [shape: s32[8,1], index: 6, kind: input, shape index: {}]   ;;  %s3125_s3 = inlined_call_operand.vmem [shape: f32[1,128], index: 3, kind: input, shape index: {}]   ;;  %s3126_s4 = inlined_call_operand.vmem [shape: f32[32,2], index: 4, kind: input, shape index: {}]   ;;  %s3127_s8 = inlined_call_operand.vmem [shape: f32[8,32], index: 8, kind: output, shape index: {1}]   ;;  %s3128_s9 = inlined_call_operand.vmem [shape: f32[8,32], index: 9, kind: output, shape index: {2}]   ;;  %s3129_s5 = inlined_call_operand.vmem [shape: f32[1,2], index: 5, kind: input, shape index: {}]   ;;  %s3130_s7 = inlined_call_operand.vmem [shape: f32[64,2], index: 7, kind: output, shape index: {0}]  }
   0x1   :  { %v37_v0 = vld [vmem:[%s3121_s1] sm:$0x3]  ;;  %v30_v3 = vld [vmem:[%s3122_s0 + $0x8] sm:$0xff]  ;;  %v31_v5 = vld [vmem:[%s3122_s0 + $0x10] sm:$0xff]  ;;  %v2371_v16 = vmov 0.0   ;;  %v2372_v17 = vmov 0   ;;  %v192_v29 = vlaneseq }
   0x2   :  { %v29_v1 = vld [vmem:[%s3122_s0] sm:$0xff]  ;;  %2130 = vmatprep.subr.msk.mxu0 %vm70_vm0, %v37_v0  ;;  %2308 = vmatprep.subr.msk.mxu1 %vm70_vm0, %v37_v0  ;;  %v34_v4 = vld [vmem:[%s3122_s0 + $0x28] sm:$0xff]  ;;  %v35_v6 = vld [vmem:[%s3122_s0 + $0x30] sm:$0xff]  ;;  %v2373_v44 = vmov 0.5   ;;  %vm230_vm8 = vcmask 261120   ;;  %vm1773_vm11 = vcmask 1040384  }
   0x3   :  { %v33_v2 = vld [vmem:[%s3122_s0 + $0x20] sm:$0xff]  ;;  %2131 = vmatpush3.msk.msra.mxu0 %vm70_vm0, %v37_v0  ;;  %2309 = vmatpush3.msk.msra.mxu1 %vm70_vm0, %v37_v0  ;;  %v189_v8 = vld [vmem:[%s3123_s2 + $0x8] sm:$0xff]  ;;  %v190_v10 = vld [vmem:[%s3123_s2 + $0x10] sm:$0xff]  ;;  %v193_v38 = vand.u32 127, %v192_v29 }
   0x4   :  { %2132 = vmatprep.mubr.msk.f32.mxu0 %vm45_vm1, %v29_v1  ;;  %2138 = vmatprep.mubr.msk.f32.mxu1 %vm45_vm1, %v33_v2  ;;  %v188_v7 = vld [vmem:[%s3123_s2] sm:$0xff]  ;;  %v191_v11 = vld [vmem:[%s3123_s2 + $0x18] sm:$0xff] }
   0x5   :  { %2133 = vmatmul.mubr.msk.f32.vlgmr.msra.gmra.mrb[0].mxu0 %vm45_vm1, %v30_v3  ;;  %2139 = vmatmul.mubr.msk.f32.vlgmr.msra.gmra.mrb[0].mxu1 %vm45_vm1, %v34_v4  ;;  %v2463_v9 = vpack.c.bf16 %v189_v8, %v188_v7  ;;  %v32_v12 = vld [vmem:[%s3122_s0 + $0x18] sm:$0xff]  ;;  %v2482_v15 = vpack.c.bf16 %v191_v11, %v190_v10  ;;  %v2508_v18 = vld [vmem:[%s3124_s6] sm:$0xff]  ;;  %vm194_vm4 = vcmp.ge.s32.totalorder %v193_v38, 64  ;;  %vm195_vm5 = vcmp.lt.s32.totalorder %v193_v38, 96  ;;  %s2375_s6 = smov 32  }
   0x6   :  { %2135 = vmatprep.mubr.msk.f32.mxu0 %vm45_vm1, %v31_v5  ;;  %2141 = vmatprep.mubr.msk.f32.mxu1 %vm45_vm1, %v35_v6  ;;  %v36_v13 = vld [vmem:[%s3122_s0 + $0x38] sm:$0xff]  ;;  %vm326_vm3 = vcmp.gt.s32.totalorder %v2508_v18, 0  ;;  %v2043_v20 = vld [vmem:[%s3125_s3] ss:$0 sm:$0xff]  ;;  %vm196_vm6 = vmand %vm194_vm4, %vm195_vm5  ;;  %s2374_s3 = smov 64   ;;  %vm431_vm9 = vcmp.gt.s32.totalorder %v2508_v18, 1 }
   0x7   :  { %2252 = vmatprep.subr.bf16.mxu1 %v2369_v14  ;;  %2264 = vmatprep.subr.bf16.mxu0 %v2369_v14  ;;  %v327_v19 = vsel %vm326_vm3, 1, %v2372_v17  ;;  %v2517_v45 = vsel %vm196_vm6, 1.0, %v2373_v44  ;;  %v2520_v49 = vsel %vm196_vm6, 0.0, %v2373_v44  ;;  %v432_v10 = vsel %vm431_vm9, 1, %v2372_v17 }
   0x8   :  { %2254 = vmatpush3.bf16.msra.mxu1 %v2463_v9  ;;  %2266 = vmatpush3.bf16.msra.mxu0 %v2463_v9  ;;  %vm537_vm12 = vcmp.gt.s32.totalorder %v2508_v18, 2  ;;  %vm643_vm14 = vcmp.gt.s32.totalorder %v2508_v18, 3  ;;  %vm749_vm3 = vcmp.gt.s32.totalorder %v2508_v18, 4  ;;  %vm1799_vm5 = vcmask 1043456  }
   0x9   :  { %2136 = vmatmul.mubr.msk.f32.gmra.mrb[2].mxu0 %vm45_vm1, %v32_v12  ;;  %2142 = vmatmul.mubr.msk.f32.gmra.mrb[2].mxu1 %vm45_vm1, %v36_v13  ;;  %vm961_vm9 = vcmp.gt.s32.totalorder %v2508_v18, 6 }
   0xa   :  { %2255 = vmatprep.subr.bf16.mxu1 %v2369_v14  ;;  %2152 = vmatprep.mubr.msk.f32.mxu1 %vm2370_vm2, %v2371_v16 }
   0xb   :  { %2267 = vmatprep.subr.bf16.mxu0 %v2369_v14  ;;  %2174 = vmatprep.mubr.msk.f32.mxu0 %vm2370_vm2, %v2371_v16 }
   0xc   :  { %2257 = vmatpush3.bf16.msra.mxu1 %v2482_v15  ;;  %2269 = vmatpush3.bf16.msra.mxu0 %v2482_v15 }
   0xd   :  { %2258 = vmatprep.subr.bf16.mxu1 %v2369_v14  ;;  %2276 = vmatprep.subr.bf16.mxu0 %v2369_v14 }
   0xe   :  { %2319 = vset.pattern.permute.xlu1 %v2372_v17  ;;  %2320 = vset.pattern.permute.xlu0 %v2372_v17 }
   0xf   :  { %2153 = vmatmul.mubr.f32.vlgmr.msra.gmra.mrb[4].mxu1 %v2371_v16  ;;  %329 = vperm.xlu1 %2319, %v327_v19  }
  0x10   :  { %2260 = vmatpush3.bf16.msra.mxu1 %v2463_v9  ;;  %2163 = vmatprep.mubr.msk.f32.mxu1 %vm2370_vm2, %v2371_v16 }
  0x11   :  { %2261 = vmatprep.subr.bf16.mxu1 %v2369_v14 }
  0x14   :  { %2263 = vmatpush3.bf16.msra.mxu1 %v2482_v15 }
  0x15   :  { %2270 = vmatprep.subr.bf16.mxu1 %v2369_v14 }
  0x8e   :  { %v330_v58 = vpop.permute.xlu1 %329 }
  0x8f   :  { %vm331_vm7 = vcmp.eq.s32.totalorder %v330_v58, 1 }
  0xd8   :  { %v2134_v21 = vpop.f32.mrb[0].mxu0  ;;  %v2140_v22 = vpop.f32.mrb[0].mxu1 }
  0xd9   :  { %v146_v23 = vadd.f32 %v2134_v21, %v2043_v20  ;;  %v166_v24 = vadd.f32 %v2140_v22, %v2043_v20  ;;  %v140_v25 = vpop.f32.mrb[1].mxu0  ;;  %v160_v26 = vpop.f32.mrb[1].mxu1 }
  0xda   :  { %v141_v27 = vadd.f32 %v2043_v20, %v140_v25  ;;  %v161_v28 = vadd.f32 %v2043_v20, %v160_v26  ;;  %v1091_v26 = vshrl.u32 %v192_v29, 7 }
  0xdb   :  { %180 = vst [vmem:[#allocation2 + $0x8] sm:$0xff] %v146_v23  ;;  %184 = vst [vmem:[#allocation2 + $0x28] sm:$0xff] %v166_v24  ;;  %v2376_v23 = vmov 1966171168  }
  0xdc   :  { %179 = vst [vmem:[#allocation2] sm:$0xff] %v141_v27  ;;  %183 = vst [vmem:[#allocation2 + $0x20] sm:$0xff] %v161_v28  ;;  %v2137_v30 = vpop.f32.mrb[2].mxu0  ;;  %v2143_v31 = vpop.f32.mrb[2].mxu1  ;;  %v1088_v24 = vunpack.c.l.s4 %v2376_v23 }
  0xdd   :  { %v156_v32 = vadd.f32 %v2137_v30, %v2043_v20  ;;  %v176_v33 = vadd.f32 %v2143_v31, %v2043_v20  ;;  %v150_v34 = vpop.f32.mrb[3].mxu0  ;;  %v170_v35 = vpop.f32.mrb[3].mxu1 }
  0xde   :  { %v151_v36 = vadd.f32 %v2043_v20, %v150_v34  ;;  %v171_v37 = vadd.f32 %v2043_v20, %v170_v35  ;;  %v1089_v25 = vunpack.c.0.s8 %v1088_v24 }
  0xdf   :  { %182 = vst [vmem:[#allocation2 + $0x18] sm:$0xff] %v156_v32  ;;  %186 = vst [vmem:[#allocation2 + $0x38] sm:$0xff] %v176_v33 }
  0xe0   :  { %181 = vst [vmem:[#allocation2 + $0x10] sm:$0xff] %v151_v36  ;;  %185 = vst [vmem:[#allocation2 + $0x30] sm:$0xff] %v171_v37  ;;  %v2552_v27 = vsub.s32 %v1089_v25, %v1091_v26 }
  0xe2   :  { %v300_v39 = vpop.f32.mrb[4].mxu1 }
  0xe3   :  { %v2154_v40 = vpop.f32.mrb[5].mxu1 }
  0xe7   :  { %v199_v41 = vld [vmem:[#allocation2] ss:$8 sm:$0xf]  ;;  %v203_v63 = vld [vmem:[#allocation2 + $0x1] ss:$8 sm:$0xf] }
  0xe8   :  { %v200_v42 = vld [vmem:[#allocation2] ss:$8 sm:$0xf0]  ;;  %v204_v0 = vld [vmem:[#allocation2 + $0x1] ss:$8 sm:$0xf0] }
  0xe9   :  { %v201_v43 = vor.u32 %v200_v42, %v199_v41  ;;  %v205_v1 = vor.u32 %v204_v0, %v203_v63  ;;  %v207_v23 = vld [vmem:[#allocation2 + $0x2] ss:$8 sm:$0xf] }
  0xea   :  { %v208_v24 = vld [vmem:[#allocation2 + $0x2] ss:$8 sm:$0xf0] }
  0xeb   :  { %v304_v46 = vadd.f32 %v300_v39, %v201_v43  ;;  %v2568_v39 = vsub.s32 0, %v1091_v26  ;;  %v209_v25 = vor.u32 %v208_v24, %v207_v23 }
  0xed   :  { %v305_v47 = vmul.f32 %v304_v46, %v2517_v45 }
  0xef   :  { %2321 = vtanh.f32 %v305_v47 }
  0xf9   :  { %v2322_v48 = vpop.eup %2321 }
  0xfa   :  { %v307_v50 = vmul.f32 %v2322_v48, %v2517_v45 }
  0xfc   :  { %v308_v51 = vadd.f32 %v307_v50, %v2520_v49 }
  0xfe   :  { %311 = vrot.lane.b32.xlu0 %v308_v51, %s2374_s3  ;;  %v309_v54 = vmul.f32 0.0, %v308_v51 }
 0x170   :  { %v312_v52 = vpop.permute.xlu0 %311 }
 0x171   :  { %v314_v53 = vmul.f32 %v312_v52, %v308_v51 }
 0x173   :  { %316 = vrot.lane.b32.xlu0 %v314_v53, %s2375_s6 }
 0x1e5   :  { %v317_v55 = vpop.permute.xlu0 %316 }
 0x1e6   :  { %v319_v56 = vadd.f32 %v317_v55, %v309_v54 }
 0x1e8   :  { %2323 = vtanh.f32 %v319_v56  ;;  %v2544_v13 = vsel %vm331_vm7, %v319_v56, 0.0 }
 0x1f2   :  { %v2324_v57 = vpop.eup %2323 }
 0x1f3   :  { %322 = vrot.lane.b32.xlu1 %v2324_v57, %s2374_s3 }
 0x265   :  { %v323_v59 = vpop.permute.xlu1 %322 }
 0x266   :  { %v325_v60 = vmul.f32 %v323_v59, %v308_v51 }
 0x268   :  { %v332_v61 = vsel %vm331_vm7, %v325_v60, 0.0  ;;  %vm1808_vm7 = vcmask 1044480  }
 0x269   :  { %335 = vrot.lane.b32.xlu0 %v332_v61, %s2375_s6  ;;  %v1086_v28 = vcombine.high %v332_v61, %v332_v61  ;;  %v1093_v30 = vrot.slane %v332_v61, %v2552_v27 }
 0x26b   :  { %v1100_v33 = vrot.slane %v1086_v28, %v2552_v27  ;;  %v1101_v35 = vcombine.high %v1093_v30, %v1093_v30  ;;  %v1109_v41 = vrot.slane %v1093_v30, %v2552_v27 }
 0x26d   :  { %v1102_v40 = vcombine.high %v1100_v33, %v1100_v33  ;;  %v1116_v42 = vrot.slane %v1100_v33, %v2552_v27  ;;  %v1123_v47 = vrot.slane %v1101_v35, %v2552_v27  ;;  %v1131_v54 = vcombine.high %v1109_v41, %v1109_v41 }
 0x26f   :  { %v1130_v53 = vrot.slane %v1102_v40, %v2552_v27  ;;  %v1132_v55 = vcombine.high %v1116_v42, %v1116_v42 }
 0x2db   :  { %v336_v62 = vpop.permute.xlu0 %335 }
 0x2dc   :  { %2164 = vmatmul.mubr.msk.f32.vlgmr.msra.gmra.mrb[6].mxu1 %vm230_vm8, %v336_v62 }
 0x2dd   :  { %2272 = vmatpush3.bf16.msra.mxu1 %v2463_v9  ;;  %2185 = vmatprep.mubr.msk.f32.mxu1 %vm2370_vm2, %v2371_v16 }
 0x2de   :  { %2273 = vmatprep.subr.bf16.mxu1 %v2369_v14 }
 0x2e1   :  { %2275 = vmatpush3.bf16.msra.mxu1 %v2482_v15 }
 0x2e2   :  { %2282 = vmatprep.subr.bf16.mxu1 %v2369_v14 }
 0x3af   :  { %v405_v2 = vpop.f32.mrb[6].mxu1 }
 0x3b0   :  { %v409_v3 = vadd.f32 %v405_v2, %v205_v1  ;;  %v2165_v4 = vpop.f32.mrb[7].mxu1 }
 0x3b2   :  { %v410_v5 = vmul.f32 %v409_v3, %v2517_v45 }
 0x3b4   :  { %2325 = vtanh.f32 %v410_v5  ;;  %v1134_v5 = vcombine.high %v1130_v53, %v1130_v53 }
 0x3be   :  { %v2326_v6 = vpop.eup %2325 }
 0x3bf   :  { %v412_v7 = vmul.f32 %v2326_v6, %v2517_v45 }
 0x3c1   :  { %v413_v8 = vadd.f32 %v412_v7, %v2520_v49 }
 0x3c3   :  { %416 = vrot.lane.b32.xlu1 %v413_v8, %s2374_s3  ;;  %v414_v19 = vmul.f32 %v413_v8, %v2544_v13 }
 0x3c7   :  { %434 = vperm.xlu1 %2319, %v432_v10  }
 0x435   :  { %v417_v11 = vpop.permute.xlu1 %416 }
 0x436   :  { %v419_v12 = vmul.f32 %v417_v11, %v413_v8 }
 0x438   :  { %421 = vrot.lane.b32.xlu0 %v419_v12, %s2375_s6 }
 0x446   :  { %v2555_v31 = vpop.permute.xlu1 %434 }
 0x447   :  { %vm436_vm10 = vcmp.eq.s32.totalorder %v2555_v31, 1 }
 0x4aa   :  { %v422_v20 = vpop.permute.xlu0 %421 }
 0x4ab   :  { %v2547_v21 = vadd.f32 %v422_v20, %v414_v19 }
 0x4ad   :  { %2327 = vtanh.f32 %v2547_v21  ;;  %v2629_v40 = vsel %vm436_vm10, %v2547_v21, %v2544_v13 }
 0x4b7   :  { %v2328_v22 = vpop.eup %2327 }
 0x4b8   :  { %427 = vrot.lane.b32.xlu0 %v2328_v22, %s2374_s3 }
 0x52a   :  { %v428_v32 = vpop.permute.xlu0 %427 }
 0x52b   :  { %v430_v34 = vmul.f32 %v428_v32, %v413_v8 }
 0x52d   :  { %v439_v36 = vsel %vm436_vm10, %v430_v34, 0.0  ;;  %v2563_v29 = vsel %vm436_vm10, %v430_v34, %v332_v61  ;;  %v1133_v61 = vcombine.high %v1123_v47, %v1123_v47 }
 0x52e   :  { %v1144_v37 = vcombine.high %v439_v36, %v439_v36  ;;  %v1151_v38 = vrot.slane %v439_v36, %v2552_v27  ;;  %441 = vrot.lane.b32.xlu1 %v2563_v29, %s2375_s6  ;;  %v538_v36 = vsel %vm537_vm12, 1, %v2372_v17  ;;  %vm1067_vm12 = vcmp.gt.s32.totalorder %v2508_v18, 7 }
 0x530   :  { %v1158_v43 = vrot.slane %v1144_v37, %v2552_v27  ;;  %v1159_v44 = vcombine.high %v1151_v38, %v1151_v38  ;;  %v1167_v46 = vrot.slane %v1151_v38, %v2552_v27 }
 0x532   :  { %v1160_v48 = vcombine.high %v1158_v43, %v1158_v43  ;;  %v1174_v50 = vrot.slane %v1158_v43, %v2552_v27  ;;  %v1181_v51 = vrot.slane %v1159_v44, %v2552_v27  ;;  %v1189_v52 = vcombine.high %v1167_v46, %v1167_v46 }
 0x533   :  { %v1496_v56 = vrot.slane %v1167_v46, %v2568_v39 }
 0x534   :  { %v1188_v57 = vrot.slane %v1160_v48, %v2552_v27  ;;  %v1190_v58 = vcombine.high %v1174_v50, %v1174_v50  ;;  %v1191_v59 = vcombine.high %v1181_v51, %v1181_v51  ;;  %v1500_v60 = vrot.slane %v1181_v51, %v2568_v39 }
 0x535   :  { %v1504_v62 = vrot.slane %v1189_v52, %v2568_v39  ;;  %v1512_v63 = vrot.slane %v1174_v50, %v2568_v39  ;;  %v2584_v0 = vsel %vm1773_vm11, %v1109_v41, %v1496_v56 }
 0x536   :  { %v1192_v1 = vcombine.high %v1188_v57, %v1188_v57  ;;  %v1508_v2 = vrot.slane %v1191_v59, %v2568_v39  ;;  %v1516_v3 = vrot.slane %v1188_v57, %v2568_v39  ;;  %v1520_v4 = vrot.slane %v1190_v58, %v2568_v39 }
 0x537   :  { %v2590_v6 = vsel %vm1773_vm11, %v1123_v47, %v1500_v60  ;;  %v2593_v7 = vsel %vm1773_vm11, %v1131_v54, %v1504_v62  ;;  %v2596_v8 = vsel %vm1773_vm11, %v1116_v42, %v1512_v63 }
 0x538   :  { %v1524_v10 = vrot.slane %v1192_v1, %v2568_v39  ;;  %v2600_v11 = vsel %vm1773_vm11, %v1133_v61, %v1508_v2  ;;  %v2603_v12 = vsel %vm1773_vm11, %v1130_v53, %v1516_v3  ;;  %v2606_v19 = vsel %vm1773_vm11, %v1132_v55, %v1520_v4 }
 0x53a   :  { %v2609_v20 = vsel %vm1773_vm11, %v1134_v5, %v1524_v10  ;;  %vm1817_vm11 = vcmask 1045504  }
 0x5a0   :  { %v442_v22 = vpop.permute.xlu1 %441 }
 0x5a1   :  { %2175 = vmatmul.mubr.msk.f32.vlgmr.msra.gmra.mrb[4].mxu0 %vm230_vm8, %v442_v22 }
 0x5a2   :  { %2278 = vmatpush3.bf16.msra.mxu0 %v2463_v9  ;;  %2196 = vmatprep.mubr.msk.f32.mxu0 %vm2370_vm2, %v2371_v16 }
 0x5a3   :  { %2279 = vmatprep.subr.bf16.mxu0 %v2369_v14 }
 0x5a6   :  { %2281 = vmatpush3.bf16.msra.mxu0 %v2482_v15 }
 0x5a7   :  { %2288 = vmatprep.subr.bf16.mxu0 %v2369_v14 }
 0x674   :  { %v511_v26 = vpop.f32.mrb[4].mxu0 }
 0x675   :  { %v515_v28 = vadd.f32 %v511_v26, %v209_v25  ;;  %v2176_v30 = vpop.f32.mrb[5].mxu0 }
 0x677   :  { %v516_v32 = vmul.f32 %v515_v28, %v2517_v45 }
 0x679   :  { %2329 = vtanh.f32 %v516_v32 }
 0x683   :  { %v2330_v33 = vpop.eup %2329 }
 0x684   :  { %v518_v34 = vmul.f32 %v2330_v33, %v2517_v45 }
 0x686   :  { %v519_v35 = vadd.f32 %v518_v34, %v2520_v49 }
 0x688   :  { %522 = vrot.lane.b32.xlu0 %v519_v35, %s2374_s3  ;;  %v520_v41 = vmul.f32 %v519_v35, %v2629_v40 }
 0x68c   :  { %540 = vperm.xlu0 %2320, %v538_v36  }
 0x6fa   :  { %v523_v37 = vpop.permute.xlu0 %522 }
 0x6fb   :  { %v525_v38 = vmul.f32 %v523_v37, %v519_v35 }
 0x6fd   :  { %527 = vrot.lane.b32.xlu1 %v525_v38, %s2375_s6 }
 0x70b   :  { %v2636_v46 = vpop.permute.xlu0 %540 }
 0x70c   :  { %vm542_vm13 = vcmp.eq.s32.totalorder %v2636_v46, 1 }
 0x76f   :  { %v528_v42 = vpop.permute.xlu1 %527 }
 0x770   :  { %v2632_v43 = vadd.f32 %v528_v42, %v520_v41 }
 0x772   :  { %2331 = vtanh.f32 %v2632_v43  ;;  %v2712_v38 = vsel %vm542_vm13, %v2632_v43, %v2629_v40 }
 0x77c   :  { %v2332_v44 = vpop.eup %2331 }
 0x77d   :  { %533 = vrot.lane.b32.xlu1 %v2332_v44, %s2374_s3 }
 0x7ef   :  { %v534_v47 = vpop.permute.xlu1 %533 }
 0x7f0   :  { %v536_v48 = vmul.f32 %v534_v47, %v519_v35  ;;  %v644_v35 = vsel %vm643_vm14, 1, %v2372_v17  ;;  %vm1826_vm14 = vcmask 1046528  }
 0x7f2   :  { %v545_v13 = vsel %vm542_vm13, %v536_v48, 0.0  ;;  %v2644_v21 = vsel %vm542_vm13, %v536_v48, %v2563_v29 }
 0x7f3   :  { %v1194_v31 = vcombine.high %v545_v13, %v545_v13  ;;  %v1201_v50 = vrot.slane %v545_v13, %v2552_v27  ;;  %547 = vrot.lane.b32.xlu1 %v2644_v21, %s2375_s6 }
 0x7f5   :  { %v1208_v51 = vrot.slane %v1194_v31, %v2552_v27  ;;  %v1209_v52 = vcombine.high %v1201_v50, %v1201_v50  ;;  %v1217_v53 = vrot.slane %v1201_v50, %v2552_v27 }
 0x7f7   :  { %v1210_v54 = vcombine.high %v1208_v51, %v1208_v51  ;;  %v1224_v55 = vrot.slane %v1208_v51, %v2552_v27  ;;  %v1231_v56 = vrot.slane %v1209_v52, %v2552_v27  ;;  %v1239_v57 = vcombine.high %v1217_v53, %v1217_v53 }
 0x7f8   :  { %v1536_v29 = vrot.slane %v1217_v53, %v2568_v39 }
 0x7f9   :  { %v1238_v58 = vrot.slane %v1210_v54, %v2552_v27  ;;  %v1240_v59 = vcombine.high %v1224_v55, %v1224_v55  ;;  %v1241_v60 = vcombine.high %v1231_v56, %v1231_v56  ;;  %v1540_v61 = vrot.slane %v1231_v56, %v2568_v39 }
 0x7fa   :  { %v1544_v62 = vrot.slane %v1239_v57, %v2568_v39  ;;  %v1552_v63 = vrot.slane %v1224_v55, %v2568_v39  ;;  %v2660_v1 = vsel %vm70_vm0, %v2584_v0, %v1536_v29 }
 0x7fb   :  { %v1242_v2 = vcombine.high %v1238_v58, %v1238_v58  ;;  %v1548_v3 = vrot.slane %v1241_v60, %v2568_v39  ;;  %v1556_v4 = vrot.slane %v1238_v58, %v2568_v39  ;;  %v1560_v5 = vrot.slane %v1240_v59, %v2568_v39 }
 0x7fc   :  { %v2667_v10 = vsel %vm70_vm0, %v2590_v6, %v1540_v61  ;;  %v2671_v22 = vsel %vm70_vm0, %v2593_v7, %v1544_v62  ;;  %v2675_v23 = vsel %vm70_vm0, %v2596_v8, %v1552_v63 }
 0x7fd   :  { %v1564_v0 = vrot.slane %v1242_v2, %v2568_v39  ;;  %v2680_v24 = vsel %vm70_vm0, %v2600_v11, %v1548_v3  ;;  %v2684_v25 = vsel %vm70_vm0, %v2603_v12, %v1556_v4  ;;  %v2688_v6 = vsel %vm70_vm0, %v2606_v19, %v1560_v5  ;;  %v211_v11 = vld [vmem:[#allocation2 + $0x3] ss:$8 sm:$0xf] }
 0x7fe   :  { %v212_v12 = vld [vmem:[#allocation2 + $0x3] ss:$8 sm:$0xf0] }
 0x7ff   :  { %v2692_v7 = vsel %vm70_vm0, %v2609_v20, %v1564_v0  ;;  %v213_v19 = vor.u32 %v212_v12, %v211_v11  ;;  %vm1790_vm0 = vcmask 1042432  }
 0x865   :  { %v548_v8 = vpop.permute.xlu1 %547 }
 0x866   :  { %2186 = vmatmul.mubr.msk.f32.vlgmr.msra.gmra.mrb[8].mxu1 %vm230_vm8, %v548_v8 }
 0x867   :  { %2284 = vmatpush3.bf16.msra.mxu1 %v2463_v9  ;;  %2207 = vmatprep.mubr.msk.f32.mxu1 %vm2370_vm2, %v2371_v16 }
 0x868   :  { %2285 = vmatprep.subr.bf16.mxu1 %v2369_v14 }
 0x86b   :  { %2287 = vmatpush3.bf16.msra.mxu1 %v2482_v15 }
 0x86c   :  { %2294 = vmatprep.subr.bf16.mxu1 %v2369_v14 }
 0x939   :  { %v617_v26 = vpop.f32.mrb[8].mxu1 }
 0x93a   :  { %v621_v20 = vadd.f32 %v617_v26, %v213_v19  ;;  %v2187_v28 = vpop.f32.mrb[9].mxu1 }
 0x93c   :  { %v622_v30 = vmul.f32 %v621_v20, %v2517_v45 }
 0x93e   :  { %2333 = vtanh.f32 %v622_v30 }
 0x948   :  { %v2334_v32 = vpop.eup %2333 }
 0x949   :  { %v624_v33 = vmul.f32 %v2334_v32, %v2517_v45 }
 0x94b   :  { %v625_v34 = vadd.f32 %v624_v33, %v2520_v49 }
 0x94d   :  { %628 = vrot.lane.b32.xlu0 %v625_v34, %s2374_s3  ;;  %v626_v41 = vmul.f32 %v625_v34, %v2712_v38 }
 0x951   :  { %646 = vperm.xlu0 %2320, %v644_v35  }
 0x9bf   :  { %v629_v36 = vpop.permute.xlu0 %628 }
 0x9c0   :  { %v631_v37 = vmul.f32 %v629_v36, %v625_v34 }
 0x9c2   :  { %633 = vrot.lane.b32.xlu1 %v631_v37, %s2375_s6 }
 0x9d0   :  { %v2719_v48 = vpop.permute.xlu0 %646 }
 0x9d1   :  { %vm648_vm15 = vcmp.eq.s32.totalorder %v2719_v48, 1 }
 0xa34   :  { %v634_v42 = vpop.permute.xlu1 %633 }
 0xa35   :  { %v2715_v44 = vadd.f32 %v634_v42, %v626_v41 }
 0xa37   :  { %2335 = vtanh.f32 %v2715_v44  ;;  %v2794_v37 = vsel %vm648_vm15, %v2715_v44, %v2712_v38 }
 0xa41   :  { %v2336_v47 = vpop.eup %2335 }
 0xa42   :  { %639 = vrot.lane.b32.xlu1 %v2336_v47, %s2374_s3 }
 0xab4   :  { %v640_v13 = vpop.permute.xlu1 %639 }
 0xab5   :  { %v642_v31 = vmul.f32 %v640_v13, %v625_v34  ;;  %v750_v34 = vsel %vm749_vm3, 1, %v2372_v17 }
 0xab7   :  { %v651_v40 = vsel %vm648_vm15, %v642_v31, 0.0  ;;  %v2727_v43 = vsel %vm648_vm15, %v642_v31, %v2644_v21 }
 0xab8   :  { %v1244_v46 = vcombine.high %v651_v40, %v651_v40  ;;  %v1251_v50 = vrot.slane %v651_v40, %v2552_v27  ;;  %653 = vrot.lane.b32.xlu0 %v2727_v43, %s2375_s6 }
 0xaba   :  { %v1258_v51 = vrot.slane %v1244_v46, %v2552_v27  ;;  %v1259_v52 = vcombine.high %v1251_v50, %v1251_v50  ;;  %v1267_v53 = vrot.slane %v1251_v50, %v2552_v27 }
 0xabc   :  { %v1260_v54 = vcombine.high %v1258_v51, %v1258_v51  ;;  %v1274_v55 = vrot.slane %v1258_v51, %v2552_v27  ;;  %v1281_v56 = vrot.slane %v1259_v52, %v2552_v27  ;;  %v1289_v57 = vcombine.high %v1267_v53, %v1267_v53 }
 0xabd   :  { %v1576_v21 = vrot.slane %v1267_v53, %v2568_v39 }
 0xabe   :  { %v1288_v29 = vrot.slane %v1260_v54, %v2552_v27  ;;  %v1290_v58 = vcombine.high %v1274_v55, %v1274_v55  ;;  %v1291_v59 = vcombine.high %v1281_v56, %v1281_v56  ;;  %v1580_v60 = vrot.slane %v1281_v56, %v2568_v39 }
 0xabf   :  { %v1584_v61 = vrot.slane %v1289_v57, %v2568_v39  ;;  %v1592_v62 = vrot.slane %v1274_v55, %v2568_v39  ;;  %v2743_v63 = vsel %vm1790_vm0, %v2660_v1, %v1576_v21 }
 0xac0   :  { %v1292_v2 = vcombine.high %v1288_v29, %v1288_v29  ;;  %v1588_v3 = vrot.slane %v1291_v59, %v2568_v39  ;;  %v1596_v4 = vrot.slane %v1288_v29, %v2568_v39  ;;  %v1600_v5 = vrot.slane %v1290_v58, %v2568_v39 }
 0xac1   :  { %v2750_v0 = vsel %vm1790_vm0, %v2667_v10, %v1580_v60  ;;  %v2754_v8 = vsel %vm1790_vm0, %v2671_v22, %v1584_v61  ;;  %v2758_v11 = vsel %vm1790_vm0, %v2675_v23, %v1592_v62 }
 0xac2   :  { %v1604_v1 = vrot.slane %v1292_v2, %v2568_v39  ;;  %v2763_v12 = vsel %vm1790_vm0, %v2680_v24, %v1588_v3  ;;  %v2767_v19 = vsel %vm1790_vm0, %v2684_v25, %v1596_v4  ;;  %v2771_v10 = vsel %vm1790_vm0, %v2688_v6, %v1600_v5  ;;  %v215_v24 = vld [vmem:[#allocation2 + $0x4] ss:$8 sm:$0xf] }
 0xac3   :  { %v216_v25 = vld [vmem:[#allocation2 + $0x4] ss:$8 sm:$0xf0] }
 0xac4   :  { %v2775_v22 = vsel %vm1790_vm0, %v2692_v7, %v1604_v1  ;;  %v217_v6 = vor.u32 %v216_v25, %v215_v24 }
 0xb2a   :  { %v654_v23 = vpop.permute.xlu0 %653 }
 0xb2b   :  { %2197 = vmatmul.mubr.msk.f32.vlgmr.msra.gmra.mrb[6].mxu0 %vm230_vm8, %v654_v23 }
 0xb2c   :  { %2290 = vmatpush3.bf16.msra.mxu0 %v2463_v9  ;;  %2218 = vmatprep.mubr.msk.f32.mxu0 %vm2370_vm2, %v2371_v16 }
 0xb2d   :  { %2291 = vmatprep.subr.bf16.mxu0 %v2369_v14 }
 0xb30   :  { %2293 = vmatpush3.bf16.msra.mxu0 %v2482_v15 }
 0xbfe   :  { %v723_v26 = vpop.f32.mrb[6].mxu0 }
 0xbff   :  { %v727_v20 = vadd.f32 %v723_v26, %v217_v6  ;;  %v2198_v28 = vpop.f32.mrb[7].mxu0 }
 0xc01   :  { %v728_v7 = vmul.f32 %v727_v20, %v2517_v45 }
 0xc03   :  { %2337 = vtanh.f32 %v728_v7 }
 0xc0d   :  { %v2338_v30 = vpop.eup %2337 }
 0xc0e   :  { %v730_v32 = vmul.f32 %v2338_v30, %v2517_v45 }
 0xc10   :  { %v731_v33 = vadd.f32 %v730_v32, %v2520_v49 }
 0xc12   :  { %734 = vrot.lane.b32.xlu1 %v731_v33, %s2374_s3  ;;  %v732_v41 = vmul.f32 %v731_v33, %v2794_v37 }
 0xc16   :  { %752 = vperm.xlu1 %2319, %v750_v34  }
 0xc84   :  { %v735_v35 = vpop.permute.xlu1 %734 }
 0xc85   :  { %v737_v36 = vmul.f32 %v735_v35, %v731_v33 }
 0xc87   :  { %739 = vrot.lane.b32.xlu0 %v737_v36, %s2375_s6 }
 0xc95   :  { %v2801_v31 = vpop.permute.xlu1 %752 }
 0xc96   :  { %vm754_vm4 = vcmp.eq.s32.totalorder %v2801_v31, 1 }
 0xcf9   :  { %v740_v42 = vpop.permute.xlu0 %739 }
 0xcfa   :  { %v2797_v47 = vadd.f32 %v740_v42, %v732_v41 }
 0xcfc   :  { %2339 = vtanh.f32 %v2797_v47  ;;  %v2876_v32 = vsel %vm754_vm4, %v2797_v47, %v2794_v37 }
 0xd06   :  { %v2340_v13 = vpop.eup %2339 }
 0xd07   :  { %745 = vrot.lane.b32.xlu0 %v2340_v13, %s2374_s3 }
 0xd79   :  { %v746_v40 = vpop.permute.xlu0 %745 }
 0xd7a   :  { %v748_v46 = vmul.f32 %v746_v40, %v731_v33 }
 0xd7c   :  { %v757_v38 = vsel %vm754_vm4, %v748_v46, 0.0  ;;  %v2809_v44 = vsel %vm754_vm4, %v748_v46, %v2727_v43 }
 0xd7d   :  { %v1294_v48 = vcombine.high %v757_v38, %v757_v38  ;;  %v1301_v50 = vrot.slane %v757_v38, %v2552_v27  ;;  %759 = vrot.lane.b32.xlu1 %v2809_v44, %s2375_s6 }
 0xd7f   :  { %v1308_v51 = vrot.slane %v1294_v48, %v2552_v27  ;;  %v1309_v52 = vcombine.high %v1301_v50, %v1301_v50  ;;  %v1317_v53 = vrot.slane %v1301_v50, %v2552_v27 }
 0xd81   :  { %v1310_v54 = vcombine.high %v1308_v51, %v1308_v51  ;;  %v1324_v55 = vrot.slane %v1308_v51, %v2552_v27  ;;  %v1331_v56 = vrot.slane %v1309_v52, %v2552_v27  ;;  %v1339_v57 = vcombine.high %v1317_v53, %v1317_v53 }
 0xd82   :  { %v1616_v43 = vrot.slane %v1317_v53, %v2568_v39 }
 0xd83   :  { %v1338_v21 = vrot.slane %v1310_v54, %v2552_v27  ;;  %v1340_v29 = vcombine.high %v1324_v55, %v1324_v55  ;;  %v1341_v58 = vcombine.high %v1331_v56, %v1331_v56  ;;  %v1620_v59 = vrot.slane %v1331_v56, %v2568_v39 }
 0xd84   :  { %v1624_v60 = vrot.slane %v1339_v57, %v2568_v39  ;;  %v1632_v61 = vrot.slane %v1324_v55, %v2568_v39  ;;  %v2825_v62 = vsel %vm1799_vm5, %v2743_v63, %v1616_v43 }
 0xd85   :  { %v1342_v2 = vcombine.high %v1338_v21, %v1338_v21  ;;  %v1628_v3 = vrot.slane %v1341_v58, %v2568_v39  ;;  %v1636_v4 = vrot.slane %v1338_v21, %v2568_v39  ;;  %v1640_v5 = vrot.slane %v1340_v29, %v2568_v39 }
 0xd86   :  { %v2832_v1 = vsel %vm1799_vm5, %v2750_v0, %v1620_v59  ;;  %v2836_v23 = vsel %vm1799_vm5, %v2754_v8, %v1624_v60  ;;  %v2840_v24 = vsel %vm1799_vm5, %v2758_v11, %v1632_v61 }
 0xd87   :  { %v2844_v63 = vsel %vm1799_vm5, %v2763_v12, %v1628_v3  ;;  %v2848_v25 = vsel %vm1799_vm5, %v2767_v19, %v1636_v4  ;;  %v2852_v0 = vsel %vm1799_vm5, %v2771_v10, %v1640_v5  ;;  %v1644_v6 = vrot.slane %v1342_v2, %v2568_v39  ;;  %v219_v12 = vld [vmem:[#allocation2 + $0x5] ss:$8 sm:$0xf] }
 0xd88   :  { %v220_v19 = vld [vmem:[#allocation2 + $0x5] ss:$8 sm:$0xf0] }
 0xd89   :  { %v2857_v8 = vsel %vm1799_vm5, %v2775_v22, %v1644_v6  ;;  %v221_v10 = vor.u32 %v220_v19, %v219_v12 }
 0xdef   :  { %v760_v11 = vpop.permute.xlu1 %759 }
 0xdf0   :  { %2208 = vmatmul.mubr.msk.f32.vlgmr.msra.gmra.mrb[10].mxu1 %vm230_vm8, %v760_v11  ;;  %v223_v11 = vld [vmem:[#allocation2 + $0x6] ss:$8 sm:$0xf] }
 0xdf1   :  { %2296 = vmatpush3.bf16.msra.mxu1 %v2463_v9  ;;  %2229 = vmatprep.mubr.msk.f32.mxu1 %vm2370_vm2, %v2371_v16  ;;  %vm855_vm2 = vcmp.gt.s32.totalorder %v2508_v18, 5  ;;  %v1836_v18 = vld [vmem:[%s3126_s4 + $0x8] sm:$0xff] }
 0xdf2   :  { %2297 = vmatprep.subr.bf16.mxu1 %v2369_v14  ;;  %v856_v14 = vsel %vm855_vm2, 1, %v2372_v17 }
 0xdf5   :  { %2299 = vmatpush3.bf16.msra.mxu1 %v2482_v15 }
 0xec3   :  { %v829_v26 = vpop.f32.mrb[10].mxu1 }
 0xec4   :  { %v833_v20 = vadd.f32 %v829_v26, %v221_v10  ;;  %v2209_v28 = vpop.f32.mrb[11].mxu1 }
 0xec6   :  { %v834_v22 = vmul.f32 %v833_v20, %v2517_v45 }
 0xec8   :  { %2341 = vtanh.f32 %v834_v22 }
 0xed2   :  { %v2342_v7 = vpop.eup %2341 }
 0xed3   :  { %v836_v30 = vmul.f32 %v2342_v7, %v2517_v45 }
 0xed5   :  { %v837_v9 = vadd.f32 %v836_v30, %v2520_v49 }
 0xed7   :  { %840 = vrot.lane.b32.xlu0 %v837_v9, %s2374_s3  ;;  %v838_v33 = vmul.f32 %v837_v9, %v2876_v32 }
 0xedb   :  { %858 = vperm.xlu0 %2320, %v856_v14  }
 0xf49   :  { %v841_v15 = vpop.permute.xlu0 %840 }
 0xf4a   :  { %v843_v16 = vmul.f32 %v841_v15, %v837_v9 }
 0xf4c   :  { %845 = vrot.lane.b32.xlu1 %v843_v16, %s2375_s6 }
 0xf5a   :  { %v859_v41 = vpop.permute.xlu0 %858 }
 0xf5b   :  { %vm860_vm6 = vcmp.eq.s32.totalorder %v859_v41, 1 }
 0xfbe   :  { %v846_v34 = vpop.permute.xlu1 %845 }
 0xfbf   :  { %v848_v35 = vadd.f32 %v846_v34, %v838_v33 }
 0xfc1   :  { %2343 = vtanh.f32 %v848_v35  ;;  %v2943_v30 = vsel %vm860_vm6, %v848_v35, %v2876_v32 }
 0xfcb   :  { %v2344_v36 = vpop.eup %2343 }
 0xfcc   :  { %851 = vrot.lane.b32.xlu1 %v2344_v36, %s2374_s3 }
0x103e   :  { %v852_v42 = vpop.permute.xlu1 %851 }
0x103f   :  { %v854_v13 = vmul.f32 %v852_v42, %v837_v9 }
0x1041   :  { %v863_v40 = vsel %vm860_vm6, %v854_v13, 0.0  ;;  %v2883_v46 = vsel %vm860_vm6, %v854_v13, %v2809_v44 }
0x1042   :  { %v1344_v37 = vcombine.high %v863_v40, %v863_v40  ;;  %v1351_v47 = vrot.slane %v863_v40, %v2552_v27  ;;  %865 = vrot.lane.b32.xlu0 %v2883_v46, %s2375_s6 }
0x1044   :  { %v1358_v31 = vrot.slane %v1344_v37, %v2552_v27  ;;  %v1359_v38 = vcombine.high %v1351_v47, %v1351_v47  ;;  %v1367_v48 = vrot.slane %v1351_v47, %v2552_v27 }
0x1046   :  { %v1360_v50 = vcombine.high %v1358_v31, %v1358_v31  ;;  %v1374_v51 = vrot.slane %v1358_v31, %v2552_v27  ;;  %v1381_v52 = vrot.slane %v1359_v38, %v2552_v27  ;;  %v1389_v53 = vcombine.high %v1367_v48, %v1367_v48 }
0x1047   :  { %v1656_v44 = vrot.slane %v1367_v48, %v2568_v39 }
0x1048   :  { %v1388_v54 = vrot.slane %v1360_v50, %v2552_v27  ;;  %v1390_v55 = vcombine.high %v1374_v51, %v1374_v51  ;;  %v1391_v56 = vcombine.high %v1381_v52, %v1381_v52  ;;  %v1660_v57 = vrot.slane %v1381_v52, %v2568_v39 }
0x1049   :  { %v1664_v43 = vrot.slane %v1389_v53, %v2568_v39  ;;  %v1672_v21 = vrot.slane %v1374_v51, %v2568_v39  ;;  %v2899_v29 = vsel %vm1808_vm7, %v2825_v62, %v1656_v44 }
0x104a   :  { %v1392_v58 = vcombine.high %v1388_v54, %v1388_v54  ;;  %v2903_v59 = vsel %vm1808_vm7, %v2832_v1, %v1660_v57  ;;  %v1668_v60 = vrot.slane %v1391_v56, %v2568_v39  ;;  %v1676_v61 = vrot.slane %v1388_v54, %v2568_v39 }
0x104b   :  { %v2909_v2 = vsel %vm1808_vm7, %v2836_v23, %v1664_v43  ;;  %v2913_v3 = vsel %vm1808_vm7, %v2840_v24, %v1672_v21  ;;  %v1680_v62 = vrot.slane %v1390_v55, %v2568_v39 }
0x104c   :  { %v2918_v4 = vsel %vm1808_vm7, %v2844_v63, %v1668_v60  ;;  %v2922_v5 = vsel %vm1808_vm7, %v2848_v25, %v1676_v61  ;;  %v1684_v1 = vrot.slane %v1392_v58, %v2568_v39  ;;  %v224_v63 = vld [vmem:[#allocation2 + $0x6] ss:$8 sm:$0xf0] }
0x104d   :  { %v2927_v23 = vsel %vm1808_vm7, %v2852_v0, %v1680_v62  ;;  %v225_v12 = vor.u32 %v224_v63, %v223_v11 }
0x104e   :  { %v2931_v24 = vsel %vm1808_vm7, %v2857_v8, %v1684_v1  ;;  %v962_v8 = vsel %vm961_vm9, 1, %v2372_v17 }
0x10b4   :  { %v866_v6 = vpop.permute.xlu0 %865 }
0x10b5   :  { %2219 = vmatmul.mubr.msk.f32.vlgmr.msra.gmra.mrb[8].mxu0 %vm230_vm8, %v866_v6  ;;  %v227_v6 = vld [vmem:[#allocation2 + $0x7] ss:$8 sm:$0xf] }
0x1188   :  { %v935_v19 = vpop.f32.mrb[8].mxu0 }
0x1189   :  { %v939_v10 = vadd.f32 %v935_v19, %v225_v12  ;;  %v2220_v25 = vpop.f32.mrb[9].mxu0 }
0x118b   :  { %v940_v26 = vmul.f32 %v939_v10, %v2517_v45 }
0x118d   :  { %2345 = vtanh.f32 %v940_v26 }
0x1197   :  { %v2346_v20 = vpop.eup %2345 }
0x1198   :  { %v942_v0 = vmul.f32 %v2346_v20, %v2517_v45 }
0x119a   :  { %v943_v28 = vadd.f32 %v942_v0, %v2520_v49 }
0x119c   :  { %946 = vrot.lane.b32.xlu1 %v943_v28, %s2374_s3  ;;  %v944_v9 = vmul.f32 %v943_v28, %v2943_v30 }
0x11a0   :  { %964 = vperm.xlu1 %2319, %v962_v8  }
0x120e   :  { %v947_v22 = vpop.permute.xlu1 %946 }
0x120f   :  { %v949_v7 = vmul.f32 %v947_v22, %v943_v28  ;;  %v1837_v22 = vld [vmem:[%s3126_s4 + $0x10] sm:$0xff] }
0x1211   :  { %951 = vrot.lane.b32.xlu0 %v949_v7, %s2375_s6 }
0x121f   :  { %v965_v33 = vpop.permute.xlu1 %964 }
0x1220   :  { %vm966_vm10 = vcmp.eq.s32.totalorder %v965_v33, 1 }
0x1283   :  { %v952_v14 = vpop.permute.xlu0 %951 }
0x1284   :  { %v954_v15 = vadd.f32 %v952_v14, %v944_v9 }
0x1286   :  { %2347 = vtanh.f32 %v954_v15  ;;  %v3010_v0 = vsel %vm966_vm10, %v954_v15, %v2943_v30  ;;  %v1838_v30 = vld [vmem:[%s3126_s4 + $0x18] sm:$0xff] }
0x1287   :  { %v2304_v9 = vpack.c.bf16 %v1838_v30, %v1837_v22 }
0x1290   :  { %v2348_v16 = vpop.eup %2347 }
0x1291   :  { %957 = vrot.lane.b32.xlu0 %v2348_v16, %s2374_s3 }
0x1303   :  { %v958_v34 = vpop.permute.xlu0 %957 }
0x1304   :  { %v960_v36 = vmul.f32 %v958_v34, %v943_v28 }
0x1306   :  { %v969_v42 = vsel %vm966_vm10, %v960_v36, 0.0  ;;  %v2950_v13 = vsel %vm966_vm10, %v960_v36, %v2883_v46 }
0x1307   :  { %v1394_v32 = vcombine.high %v969_v42, %v969_v42  ;;  %v1401_v35 = vrot.slane %v969_v42, %v2552_v27  ;;  %971 = vrot.lane.b32.xlu1 %v2950_v13, %s2375_s6 }
0x1309   :  { %v1408_v41 = vrot.slane %v1394_v32, %v2552_v27  ;;  %v1409_v40 = vcombine.high %v1401_v35, %v1401_v35  ;;  %v1417_v37 = vrot.slane %v1401_v35, %v2552_v27 }
0x130b   :  { %v1410_v47 = vcombine.high %v1408_v41, %v1408_v41  ;;  %v1424_v31 = vrot.slane %v1408_v41, %v2552_v27  ;;  %v1431_v38 = vrot.slane %v1409_v40, %v2552_v27  ;;  %v1439_v48 = vcombine.high %v1417_v37, %v1417_v37 }
0x130c   :  { %v1696_v46 = vrot.slane %v1417_v37, %v2568_v39 }
0x130d   :  { %v1438_v50 = vrot.slane %v1410_v47, %v2552_v27  ;;  %v1440_v51 = vcombine.high %v1424_v31, %v1424_v31  ;;  %v1441_v52 = vcombine.high %v1431_v38, %v1431_v38  ;;  %v1700_v53 = vrot.slane %v1431_v38, %v2568_v39 }
0x130e   :  { %v2964_v44 = vsel %vm1817_vm11, %v2899_v29, %v1696_v46  ;;  %v1704_v54 = vrot.slane %v1439_v48, %v2568_v39  ;;  %v1712_v55 = vrot.slane %v1424_v31, %v2568_v39 }
0x130f   :  { %v2970_v56 = vsel %vm1817_vm11, %v2903_v59, %v1700_v53  ;;  %v1708_v57 = vrot.slane %v1441_v52, %v2568_v39  ;;  %v1716_v43 = vrot.slane %v1438_v50, %v2568_v39  ;;  %v1720_v21 = vrot.slane %v1440_v51, %v2568_v39 }
0x1310   :  { %v2977_v58 = vsel %vm1817_vm11, %v2909_v2, %v1704_v54  ;;  %v2981_v29 = vsel %vm1817_vm11, %v2913_v3, %v1712_v55  ;;  %v1442_v60 = vcombine.high %v1438_v50, %v1438_v50 }
0x1311   :  { %v2985_v61 = vsel %vm1817_vm11, %v2918_v4, %v1708_v57  ;;  %v2989_v59 = vsel %vm1817_vm11, %v2922_v5, %v1716_v43  ;;  %v2993_v62 = vsel %vm1817_vm11, %v2927_v23, %v1720_v21  ;;  %v228_v4 = vld [vmem:[#allocation2 + $0x7] ss:$8 sm:$0xf0] }
0x1312   :  { %v1724_v2 = vrot.slane %v1442_v60, %v2568_v39  ;;  %v229_v11 = vor.u32 %v228_v4, %v227_v6 }
0x1314   :  { %v2998_v1 = vsel %vm1817_vm11, %v2931_v24, %v1724_v2  ;;  %v1068_v24 = vsel %vm1067_vm12, 1, %v2372_v17  ;;  %v1835_v17 = vld [vmem:[%s3126_s4] sm:$0xff]  ;;  %s2377_s4 = smov 96  }
0x1315   :  { %v2300_v7 = vpack.c.bf16 %v1836_v18, %v1835_v17 }
0x1317   :  { %2301 = vmatprep.subr.bf16.mxu0 %v2300_v7 }
0x1318   :  { %2303 = vmatpush3.bf16.msra.mxu0 %v2300_v7 }
0x1319   :  { %2305 = vmatprep.subr.bf16.mxu0 %v2304_v9 }
0x131c   :  { %2307 = vmatpush3.bf16.msra.mxu0 %v2304_v9 }
0x1379   :  { %v972_v3 = vpop.permute.xlu1 %971 }
0x137a   :  { %2230 = vmatmul.mubr.msk.f32.vlgmr.msra.gmra.mrb[12].mxu1 %vm230_vm8, %v972_v3 }
0x144d   :  { %v1041_v63 = vpop.f32.mrb[12].mxu1 }
0x144e   :  { %v1045_v12 = vadd.f32 %v1041_v63, %v229_v11  ;;  %v2231_v5 = vpop.f32.mrb[13].mxu1 }
0x144f   :  { %v2060_v5 = vld [vmem:[%s3129_s5] ss:$0 sm:$0xff] }
0x1450   :  { %v1046_v19 = vmul.f32 %v1045_v12, %v2517_v45 }
0x1452   :  { %2349 = vtanh.f32 %v1046_v19 }
0x145c   :  { %v2350_v23 = vpop.eup %2349 }
0x145d   :  { %v1048_v10 = vmul.f32 %v2350_v23, %v2517_v45 }
0x145f   :  { %v1049_v25 = vadd.f32 %v1048_v10, %v2520_v49 }
0x1461   :  { %1052 = vrot.lane.b32.xlu0 %v1049_v25, %s2374_s3  ;;  %v1050_v28 = vmul.f32 %v1049_v25, %v3010_v0 }
0x1465   :  { %1070 = vperm.xlu0 %2320, %v1068_v24  }
0x14d3   :  { %v1053_v26 = vpop.permute.xlu0 %1052 }
0x14d4   :  { %v1055_v20 = vmul.f32 %v1053_v26, %v1049_v25 }
0x14d6   :  { %1057 = vrot.lane.b32.xlu1 %v1055_v20, %s2375_s6 }
0x14e4   :  { %v1071_v14 = vpop.permute.xlu0 %1070 }
0x14e5   :  { %vm1072_vm13 = vcmp.eq.s32.totalorder %v1071_v14, 1 }
0x1548   :  { %v1058_v45 = vpop.permute.xlu1 %1057 }
0x1549   :  { %v1060_v8 = vadd.f32 %v1058_v45, %v1050_v28 }
0x154b   :  { %2351 = vtanh.f32 %v1060_v8 }
0x1555   :  { %v2352_v49 = vpop.eup %2351 }
0x1556   :  { %1063 = vrot.lane.b32.xlu1 %v2352_v49, %s2374_s3 }
0x15c8   :  { %v1064_v15 = vpop.permute.xlu1 %1063 }
0x15c9   :  { %v1066_v16 = vmul.f32 %v1064_v15, %v1049_v25 }
0x15cb   :  { %v1075_v33 = vsel %vm1072_vm13, %v1066_v16, 0.0 }
0x15cc   :  { %v1444_v34 = vcombine.high %v1075_v33, %v1075_v33  ;;  %v1451_v36 = vrot.slane %v1075_v33, %v2552_v27 }
0x15ce   :  { %v1458_v42 = vrot.slane %v1444_v34, %v2552_v27  ;;  %v1459_v32 = vcombine.high %v1451_v36, %v1451_v36  ;;  %v1467_v35 = vrot.slane %v1451_v36, %v2552_v27 }
0x15d0   :  { %v1460_v41 = vcombine.high %v1458_v42, %v1458_v42  ;;  %v1474_v40 = vrot.slane %v1458_v42, %v2552_v27  ;;  %v1481_v37 = vrot.slane %v1459_v32, %v2552_v27  ;;  %v1489_v47 = vcombine.high %v1467_v35, %v1467_v35 }
0x15d1   :  { %v1736_v31 = vrot.slane %v1467_v35, %v2568_v39 }
0x15d2   :  { %v1740_v38 = vrot.slane %v1481_v37, %v2568_v39  ;;  %v1744_v48 = vrot.slane %v1489_v47, %v2568_v39  ;;  %v1491_v46 = vcombine.high %v1481_v37, %v1481_v37  ;;  %v1752_v50 = vrot.slane %v1474_v40, %v2568_v39 }
0x15d3   :  { %v1827_v51 = vsel %vm1826_vm14, %v2964_v44, %v1736_v31  ;;  %v1488_v52 = vrot.slane %v1460_v41, %v2552_v27  ;;  %v1490_v53 = vcombine.high %v1474_v40, %v1474_v40 }
0x15d4   :  { %1854 = vrot.lane.b32.xlu0 %v1827_v51, %s2375_s6  ;;  %v1828_v54 = vsel %vm1826_vm14, %v2970_v56, %v1740_v38  ;;  %v1829_v55 = vsel %vm1826_vm14, %v2977_v58, %v1744_v48  ;;  %v1748_v57 = vrot.slane %v1491_v46, %v2568_v39  ;;  %v1831_v43 = vsel %vm1826_vm14, %v2981_v29, %v1752_v50 }
0x15d5   :  { %1856 = vrot.lane.b32.xlu1 %v1828_v54, %s2375_s6  ;;  %v1756_v44 = vrot.slane %v1488_v52, %v2568_v39  ;;  %v1760_v27 = vrot.slane %v1490_v53, %v2568_v39  ;;  %v1492_v21 = vcombine.high %v1488_v52, %v1488_v52 }
0x15d6   :  { %v1830_v60 = vsel %vm1826_vm14, %v2985_v61, %v1748_v57  ;;  %v1073_v61 = vsel %vm1072_vm13, %v1066_v16, %v2950_v13 }
0x15d7   :  { %v1832_v56 = vsel %vm1826_vm14, %v2989_v59, %v1756_v44  ;;  %v1833_v58 = vsel %vm1826_vm14, %v2993_v62, %v1760_v27  ;;  %v1764_v2 = vrot.slane %v1492_v21, %v2568_v39  ;;  %v1074_v39 = vsel %vm1072_vm13, %v1060_v8, %v3010_v0 }
0x15d8   :  { %1858 = vrot.lane.b32.xlu0 %v1829_v55, %s2375_s6 }
0x15d9   :  { %1860 = vrot.lane.b32.xlu1 %v1830_v60, %s2375_s6  ;;  %v1834_v29 = vsel %vm1826_vm14, %v2998_v1, %v1764_v2 }
0x15dc   :  { %1862 = vrot.lane.b32.xlu0 %v1831_v43, %s2375_s6 }
0x15dd   :  { %1864 = vrot.lane.b32.xlu1 %v1832_v56, %s2375_s6 }
0x15e0   :  { %1866 = vrot.lane.b32.xlu0 %v1833_v58, %s2375_s6 }
0x15e1   :  { %1868 = vrot.lane.b32.xlu1 %v1834_v29, %s2375_s6 }
0x15e4   :  { %1077 = vrot.lane.b32.xlu0 %v1073_v61, %s2375_s6 }
0x15e5   :  { %1082 = vrot.lane.b32.xlu1 %v1074_v39, %s2377_s4 }
0x1646   :  { %v1855_v59 = vpop.permute.xlu0 %1854 }
0x1647   :  { %2240 = vmatprep.mubr.msk.f32.mxu0 %vm230_vm8, %v1855_v59  ;;  %v1857_v62 = vpop.permute.xlu1 %1856 }
0x1648   :  { %2241 = vmatmul.mubr.msk.f32.vlgmr.msra.gmra.mrb[10].mxu0 %vm230_vm8, %v1857_v62 }
0x164a   :  { %v1859_v1 = vpop.permute.xlu0 %1858 }
0x164b   :  { %2243 = vmatprep.mubr.msk.f32.mxu0 %vm230_vm8, %v1859_v1  ;;  %v1861_v3 = vpop.permute.xlu1 %1860 }
0x164c   :  { %2244 = vmatmul.mubr.msk.f32.gmra.mrb[12].mxu0 %vm230_vm8, %v1861_v3 }
0x164e   :  { %v1863_v13 = vpop.permute.xlu0 %1862 }
0x164f   :  { %2246 = vmatprep.mubr.msk.f32.mxu0 %vm230_vm8, %v1863_v13  ;;  %v1865_v6 = vpop.permute.xlu1 %1864 }
0x1650   :  { %2247 = vmatmul.mubr.msk.f32.gmra.mrb[14].mxu0 %vm230_vm8, %v1865_v6 }
0x1652   :  { %v1867_v4 = vpop.permute.xlu0 %1866 }
0x1653   :  { %2249 = vmatprep.mubr.msk.f32.mxu0 %vm230_vm8, %v1867_v4  ;;  %v1869_v11 = vpop.permute.xlu1 %1868 }
0x1654   :  { %2250 = vmatmul.mubr.msk.f32.gmra.mrb[16].mxu0 %vm230_vm8, %v1869_v11 }
0x1656   :  { %v1078_v63 = vpop.permute.xlu0 %1077 }
0x1657   :  { %1080 = vst.msk [vmem:[%s3127_s8] sm:$0xff] %vm230_vm8, %v1078_v63  ;;  %v1083_v12 = vpop.permute.xlu1 %1082 }
0x1658   :  { %1085 = vst.msk [vmem:[%s3128_s9] sm:$0xff] %vm230_vm8, %v1083_v12 }
0x171b   :  { %v2242_v19 = vpop.f32.mrb[10].mxu0 }
0x171c   :  { %v1958_v23 = vadd.f32 %v2242_v19, %v2060_v5  ;;  %v1952_v10 = vpop.f32.mrb[11].mxu0 }
0x171d   :  { %v1953_v25 = vadd.f32 %v2060_v5, %v1952_v10 }
0x171e   :  { %v1992_v24 = vmul.f32 0.5, %v1958_v23 }
0x171f   :  { %v1991_v26 = vmul.f32 0.5, %v1953_v25  ;;  %v2245_v20 = vpop.f32.mrb[12].mxu0 }
0x1720   :  { %2353 = vtanh.f32 %v1992_v24  ;;  %v1968_v0 = vadd.f32 %v2245_v20, %v2060_v5  ;;  %v1962_v28 = vpop.f32.mrb[13].mxu0 }
0x1721   :  { %2355 = vtanh.f32 %v1991_v26  ;;  %v1963_v45 = vadd.f32 %v2060_v5, %v1962_v28 }
0x1722   :  { %v1994_v8 = vmul.f32 0.5, %v1968_v0 }
0x1723   :  { %v1993_v49 = vmul.f32 0.5, %v1963_v45  ;;  %v2248_v17 = vpop.f32.mrb[14].mxu0 }
0x1724   :  { %2357 = vtanh.f32 %v1994_v8  ;;  %v1978_v18 = vadd.f32 %v2248_v17, %v2060_v5  ;;  %v1972_v22 = vpop.f32.mrb[15].mxu0 }
0x1725   :  { %2359 = vtanh.f32 %v1993_v49  ;;  %v1973_v7 = vadd.f32 %v2060_v5, %v1972_v22 }
0x1726   :  { %v1996_v30 = vmul.f32 0.5, %v1978_v18 }
0x1727   :  { %v1995_v9 = vmul.f32 0.5, %v1973_v7  ;;  %v2251_v14 = vpop.f32.mrb[16].mxu0 }
0x1728   :  { %2361 = vtanh.f32 %v1996_v30  ;;  %v1988_v15 = vadd.f32 %v2251_v14, %v2060_v5  ;;  %v1982_v16 = vpop.f32.mrb[17].mxu0 }
0x1729   :  { %2363 = vtanh.f32 %v1995_v9  ;;  %v1983_v33 = vadd.f32 %v2060_v5, %v1982_v16 }
0x172a   :  { %v2354_v34 = vpop.eup %2353  ;;  %v1998_v36 = vmul.f32 0.5, %v1988_v15 }
0x172b   :  { %v2356_v42 = vpop.eup %2355  ;;  %v2008_v32 = vmul.f32 0.5, %v2354_v34  ;;  %v1997_v35 = vmul.f32 0.5, %v1983_v33 }
0x172c   :  { %v2007_v41 = vmul.f32 0.5, %v2356_v42  ;;  %2365 = vtanh.f32 %v1998_v36 }
0x172d   :  { %v2016_v40 = vadd.f32 0.5, %v2008_v32  ;;  %2367 = vtanh.f32 %v1997_v35 }
0x172e   :  { %v2358_v37 = vpop.eup %2357  ;;  %v2015_v47 = vadd.f32 0.5, %v2007_v41 }
0x172f   :  { %v2360_v31 = vpop.eup %2359  ;;  %2024 = vst.msk [vmem:[%s3130_s7 + $0x8] sm:$0xff] %vm45_vm1, %v2016_v40  ;;  %v2010_v38 = vmul.f32 0.5, %v2358_v37 }
0x1730   :  { %2023 = vst.msk [vmem:[%s3130_s7] sm:$0xff] %vm45_vm1, %v2015_v47  ;;  %v2009_v48 = vmul.f32 0.5, %v2360_v31 }
0x1731   :  { %v2018_v46 = vadd.f32 0.5, %v2010_v38 }
0x1732   :  { %v2362_v50 = vpop.eup %2361  ;;  %v2017_v51 = vadd.f32 0.5, %v2009_v48 }
0x1733   :  { %v2364_v52 = vpop.eup %2363  ;;  %2026 = vst.msk [vmem:[%s3130_s7 + $0x18] sm:$0xff] %vm45_vm1, %v2018_v46  ;;  %v2012_v53 = vmul.f32 0.5, %v2362_v50 }
0x1734   :  { %2025 = vst.msk [vmem:[%s3130_s7 + $0x10] sm:$0xff] %vm45_vm1, %v2017_v51  ;;  %v2011_v54 = vmul.f32 0.5, %v2364_v52 }
0x1735   :  { %v2020_v55 = vadd.f32 0.5, %v2012_v53 }
0x1736   :  { %v2366_v57 = vpop.eup %2365  ;;  %v2019_v43 = vadd.f32 0.5, %v2011_v54 }
0x1737   :  { %v2368_v44 = vpop.eup %2367  ;;  %2028 = vst.msk [vmem:[%s3130_s7 + $0x28] sm:$0xff] %vm45_vm1, %v2020_v55  ;;  %v2014_v27 = vmul.f32 0.5, %v2366_v57 }
0x1738   :  { %2027 = vst.msk [vmem:[%s3130_s7 + $0x20] sm:$0xff] %vm45_vm1, %v2019_v43  ;;  %v2013_v21 = vmul.f32 0.5, %v2368_v44 }
0x1739   :  { %v2022_v60 = vadd.f32 0.5, %v2014_v27 }
0x173a   :  { %v2021_v56 = vadd.f32 0.5, %v2013_v21 }
0x173b   :  { %2030 = vst.msk [vmem:[%s3130_s7 + $0x38] sm:$0xff] %vm45_vm1, %v2022_v60 }
0x173c   :  { %2029 = vst.msk [vmem:[%s3130_s7 + $0x30] sm:$0xff] %vm45_vm1, %v2021_v56 }

</bundles_post_ra>
